<compile_context>
chip_gen: v7x
topology: tpu7x:2x2x1
jax: 0.10.0
libtpu: 0.0.40
codegen_flags: <defaults>
</compile_context>

<pallas_src>
import math

import jax
import jax.numpy as jnp
from jax import lax
from jax.experimental import pallas as pl
from jax.experimental.pallas import tpu as pltpu  # noqa: F401  (TPU backend)

# ----------------------------- model config ---------------------------------
B = 2            # batch
S = 8            # max_src_len / seq
D = 32           # d_model
H = 4            # num_heads
DK = D // H      # head dim
DFF = 64         # d_ff
VOCAB = 50       # src_vocab_size
NUM_LAYERS = 2
BS = B * S       # batch folded into rows
SCALE = math.sqrt(float(D))
INV_SQRT_DK = 1.0 / math.sqrt(float(DK))
LN_EPS = 1e-5
NEG_INF = -1e10


# --------------------------- in-kernel helpers --------------------------------
def _layer_norm(x, g, b):
    mu = jnp.mean(x, axis=-1, keepdims=True)
    var = jnp.mean((x - mu) ** 2, axis=-1, keepdims=True)
    return (x - mu) * lax.rsqrt(var + LN_EPS) * g + b


def _softmax_rows(s):
    m = jnp.max(s, axis=-1, keepdims=True)
    e = jnp.exp(s - m)
    # denominator >= exp(0) = 1 always (max subtracted), so no div-by-zero even
    # for fully-masked rows; approx reciprocal goes to the EUP (free slot).
    return e * pl.reciprocal(jnp.sum(e, axis=-1, keepdims=True), approx=True)


# ------------------------ single fused forward kernel -------------------------
def _fused_encoder_kernel(emb_ref, pe_ref, bias_ref,
                          wqkv_ref, bqkv_ref, wo_ref, bo_ref,
                          ln1g_ref, ln1b_ref,
                          w1_ref, b1_ref, w2_ref, b2_ref,
                          ln2g_ref, ln2b_ref,
                          out_ref):
    # embedding scale + positional encoding; x stays resident for all layers.
    x = emb_ref[...] * SCALE + pe_ref[...]            # (BS, D) f32
    bias = bias_ref[...]                              # (BS, BS) additive mask

    for l in range(NUM_LAYERS):                       # static unroll
        # ---- fused QKV projection: one (BS,D) @ (D,3D) bf16 MXU push --------
        xb = x.astype(jnp.bfloat16)
        qkv = jnp.dot(xb, wqkv_ref[l],
                      preferred_element_type=jnp.float32) + bqkv_ref[l]  # (BS,3D) f32

        wo_l = wo_ref[l]                              # (D, D) bf16
        attn = jnp.zeros((BS, D), jnp.float32)
        for h in range(H):                            # static, H = 4
            q_h = qkv[:, h * DK:(h + 1) * DK]                 # (BS, DK)
            k_h = qkv[:, D + h * DK:D + (h + 1) * DK]         # (BS, DK)
            v_h = qkv[:, 2 * D + h * DK:2 * D + (h + 1) * DK]  # (BS, DK)

            s = jnp.dot(q_h, k_h.T, preferred_element_type=jnp.float32)
            s = s * INV_SQRT_DK + bias                        # (BS, BS)
            p = _softmax_rows(s)                              # f32
            ctx = jnp.dot(p, v_h, preferred_element_type=jnp.float32)  # (BS, DK)

            # per-head Wo row-slice; accumulating avoids the lane-axis concat.
            wo_h = wo_l[h * DK:(h + 1) * DK, :]               # (DK, D) bf16
            attn = attn + jnp.dot(ctx.astype(jnp.bfloat16), wo_h,
                                  preferred_element_type=jnp.float32)
        attn = attn + bo_ref[l]

        # ---- residual + layer norm 1 (dropout = identity in eval) -----------
        x = _layer_norm(x + attn, ln1g_ref[l], ln1b_ref[l])

        # ---- position-wise feed forward --------------------------------------
        h1 = jnp.dot(x.astype(jnp.bfloat16), w1_ref[l],
                     preferred_element_type=jnp.float32) + b1_ref[l]    # (BS, DFF)
        h1 = jnp.maximum(h1, 0.0)
        ff = jnp.dot(h1.astype(jnp.bfloat16), w2_ref[l],
                     preferred_element_type=jnp.float32) + b2_ref[l]    # (BS, D)

        # ---- residual + layer norm 2 ------------------------------------------
        x = _layer_norm(x + ff, ln2g_ref[l], ln2b_ref[l])

    out_ref[...] = x


# --------------------------- parameter construction --------------------------
def make_positional_encoding(seq_len, d_model):
    pos = jnp.arange(seq_len, dtype=jnp.float32)[:, None]
    i = jnp.arange(d_model // 2, dtype=jnp.float32)[None, :]
    angle = pos / jnp.power(10000.0, (2.0 * i) / d_model)
    pe = jnp.zeros((seq_len, d_model), jnp.float32)
    pe = pe.at[:, 0::2].set(jnp.sin(angle))
    pe = pe.at[:, 1::2].set(jnp.cos(angle))
    return pe


def init_params(key):
    keys = jax.random.split(key, 1 + NUM_LAYERS)
    emb_table = jax.random.normal(keys[0], (VOCAB, D), jnp.float32)  # nn.Embedding ~ N(0,1)

    def w(k, shp):
        return jax.random.normal(k, shp, jnp.float32) * 0.02

    wqkv, wo, w1, w2 = [], [], [], []
    for li in range(NUM_LAYERS):
        ks = jax.random.split(keys[1 + li], 6)
        wq_, wk_, wv_ = w(ks[0], (D, D)), w(ks[1], (D, D)), w(ks[2], (D, D))
        wqkv.append(jnp.concatenate([wq_, wk_, wv_], axis=1))   # (D, 3D) packed QKV
        wo.append(w(ks[3], (D, D)))
        w1.append(w(ks[4], (D, DFF)))
        w2.append(w(ks[5], (DFF, D)))

    stack = lambda xs: jnp.stack(xs, axis=0)
    return dict(
        emb_table=emb_table,
        pe_tiled=jnp.tile(make_positional_encoding(S, D), (B, 1)),   # (BS, D)
        # bf16 matmul operands (f32 accumulation inside the kernel)
        wqkv=stack(wqkv).astype(jnp.bfloat16),   # (L, D, 3D)
        wo=stack(wo).astype(jnp.bfloat16),       # (L, D, D)
        w1=stack(w1).astype(jnp.bfloat16),       # (L, D, DFF)
        w2=stack(w2).astype(jnp.bfloat16),       # (L, DFF, D)
        # biases / LayerNorm params stay f32
        bqkv=jnp.zeros((NUM_LAYERS, 1, 3 * D), jnp.float32),
        bo=jnp.zeros((NUM_LAYERS, 1, D), jnp.float32),
        b1=jnp.zeros((NUM_LAYERS, 1, DFF), jnp.float32),
        b2=jnp.zeros((NUM_LAYERS, 1, D), jnp.float32),
        ln1_g=jnp.ones((NUM_LAYERS, 1, D), jnp.float32),
        ln1_b=jnp.zeros((NUM_LAYERS, 1, D), jnp.float32),
        ln2_g=jnp.ones((NUM_LAYERS, 1, D), jnp.float32),
        ln2_b=jnp.zeros((NUM_LAYERS, 1, D), jnp.float32),
    )


# ------------------------------ full forward ---------------------------------
@jax.jit
def encoder_forward(params, src_ids, src_mask):
    # TODO(synk): token-embedding gather stays in XLA (2 KiB); fusing it would
    # need a per-row DMA gather for a single-invocation kernel — not worth it.
    emb = jnp.take(params["emb_table"], src_ids.reshape(-1), axis=0)   # (BS, D)

    # block-diagonal additive attention mask, built ONCE per call:
    # allowed iff same batch element AND key position is not padding.
    mask_flat = src_mask.reshape(BS)
    batch_id = jnp.repeat(jnp.arange(B, dtype=jnp.int32), S)
    allowed = (batch_id[:, None] == batch_id[None, :]) & (mask_flat[None, :] > 0.0)
    attn_bias = jnp.where(allowed, 0.0, NEG_INF).astype(jnp.float32)   # (BS, BS)

    out = pl.pallas_call(
        _fused_encoder_kernel,
        out_shape=jax.ShapeDtypeStruct((BS, D), jnp.float32),
    )(emb, params["pe_tiled"], attn_bias,
      params["wqkv"], params["bqkv"], params["wo"], params["bo"],
      params["ln1_g"], params["ln1_b"],
      params["w1"], params["b1"], params["w2"], params["b2"],
      params["ln2_g"], params["ln2_b"])

    return out.reshape(B, S, D)   # contiguous -> free reshape outside the kernel


# ---------------------------------- main --------------------------------------
if __name__ == "__main__":
    key = jax.random.PRNGKey(0)
    pkey, dkey = jax.random.split(key)
    params = init_params(pkey)

    src_ids = jax.random.randint(dkey, (B, S), 0, VOCAB, dtype=jnp.int32)
    # batch 0: full length, batch 1: last 2 positions are padding
    src_mask = jnp.array(
        [[1.0] * S,
         [1.0] * (S - 2) + [0.0] * 2], dtype=jnp.float32)

    out = encoder_forward(params, src_ids, src_mask)
    out = jax.block_until_ready(out)
    assert out.shape == (B, S, D)
    assert bool(jnp.all(jnp.isfinite(out)))
    print("KERNEL_OK")
</pallas_src>

<mosaic_0001>
module attributes {stable_mosaic.version = 11 : i64} {
  func.func @_fused_encoder_kernel(%arg0: memref<16x32xf32, #tpu.memory_space<vmem>>, %arg1: memref<16x32xf32, #tpu.memory_space<vmem>>, %arg2: memref<16x16xf32, #tpu.memory_space<vmem>>, %arg3: memref<2x32x96xbf16, #tpu.memory_space<vmem>>, %arg4: memref<2x1x96xf32, #tpu.memory_space<vmem>>, %arg5: memref<2x32x32xbf16, #tpu.memory_space<vmem>>, %arg6: memref<2x1x32xf32, #tpu.memory_space<vmem>>, %arg7: memref<2x1x32xf32, #tpu.memory_space<vmem>>, %arg8: memref<2x1x32xf32, #tpu.memory_space<vmem>>, %arg9: memref<2x32x64xbf16, #tpu.memory_space<vmem>>, %arg10: memref<2x1x64xf32, #tpu.memory_space<vmem>>, %arg11: memref<2x64x32xbf16, #tpu.memory_space<vmem>>, %arg12: memref<2x1x32xf32, #tpu.memory_space<vmem>>, %arg13: memref<2x1x32xf32, #tpu.memory_space<vmem>>, %arg14: memref<2x1x32xf32, #tpu.memory_space<vmem>>, %arg15: memref<16x32xf32, #tpu.memory_space<vmem>>) attributes {dimension_semantics = [], scalar_prefetch = 0 : i64, scratch_operands = 0 : i64, tpu.core_type = #tpu.core_type<tc>} {
    %c0 = arith.constant 0 : index
    %c0_0 = arith.constant 0 : index
    %0 = vector.load %arg0[%c0, %c0_0] : memref<16x32xf32, #tpu.memory_space<vmem>>, vector<16x32xf32>
    %cst = arith.constant 5.65685415 : f32
    %1 = vector.broadcast %cst : f32 to vector<16x32xf32>
    %2 = arith.mulf %0, %1 : vector<16x32xf32>
    %c0_1 = arith.constant 0 : index
    %c0_2 = arith.constant 0 : index
    %3 = vector.load %arg1[%c0_1, %c0_2] : memref<16x32xf32, #tpu.memory_space<vmem>>, vector<16x32xf32>
    %4 = arith.addf %2, %3 : vector<16x32xf32>
    %c0_3 = arith.constant 0 : index
    %c0_4 = arith.constant 0 : index
    %5 = vector.load %arg2[%c0_3, %c0_4] : memref<16x16xf32, #tpu.memory_space<vmem>>, vector<16x16xf32>
    %6 = arith.truncf %4 : vector<16x32xf32> to vector<16x32xbf16>
    %c0_5 = arith.constant 0 : index
    %c0_6 = arith.constant 0 : index
    %c0_7 = arith.constant 0 : index
    %7 = vector.load %arg3[%c0_5, %c0_6, %c0_7] : memref<2x32x96xbf16, #tpu.memory_space<vmem>>, vector<1x32x96xbf16>
    %8 = vector.shape_cast %7 : vector<1x32x96xbf16> to vector<32x96xbf16>
    %cst_8 = arith.constant dense<0.000000e+00> : vector<16x96xf32>
    %9 = tpu.matmul %6, %8, %cst_8 {dimension_numbers = #tpu.dot_dimension_numbers<[1], [0], [0], [1], [0, 0, 1, 1], [], []>} : vector<16x32xbf16>, vector<32x96xbf16>, vector<16x96xf32> -> vector<16x96xf32>
    %c0_9 = arith.constant 0 : index
    %c0_10 = arith.constant 0 : index
    %c0_11 = arith.constant 0 : index
    %10 = vector.load %arg4[%c0_9, %c0_10, %c0_11] : memref<2x1x96xf32, #tpu.memory_space<vmem>>, vector<1x1x96xf32>
    %11 = vector.shape_cast %10 : vector<1x1x96xf32> to vector<1x96xf32>
    %12 = vector.broadcast %11 : vector<1x96xf32> to vector<16x96xf32>
    %13 = arith.addf %9, %12 : vector<16x96xf32>
    %c0_12 = arith.constant 0 : index
    %c0_13 = arith.constant 0 : index
    %c0_14 = arith.constant 0 : index
    %14 = vector.load %arg5[%c0_12, %c0_13, %c0_14] : memref<2x32x32xbf16, #tpu.memory_space<vmem>>, vector<1x32x32xbf16>
    %15 = vector.shape_cast %14 : vector<1x32x32xbf16> to vector<32x32xbf16>
    %cst_15 = arith.constant 0.000000e+00 : f32
    %16 = vector.broadcast %cst_15 : f32 to vector<16x32xf32>
    %17 = vector.extract_strided_slice %13 {offsets = [0, 0], sizes = [16, 8], strides = [1, 1]} : vector<16x96xf32> to vector<16x8xf32>
    %18 = vector.extract_strided_slice %13 {offsets = [0, 32], sizes = [16, 8], strides = [1, 1]} : vector<16x96xf32> to vector<16x8xf32>
    %19 = vector.extract_strided_slice %13 {offsets = [0, 64], sizes = [16, 8], strides = [1, 1]} : vector<16x96xf32> to vector<16x8xf32>
    %20 = tpu.transpose %18, [1, 0] : vector<16x8xf32> -> vector<8x16xf32>
    %cst_16 = arith.constant dense<0.000000e+00> : vector<16x16xf32>
    %21 = tpu.matmul %17, %20, %cst_16 {dimension_numbers = #tpu.dot_dimension_numbers<[1], [0], [0], [1], [0, 0, 1, 1], [], []>} : vector<16x8xf32>, vector<8x16xf32>, vector<16x16xf32> -> vector<16x16xf32>
    %cst_17 = arith.constant 0.353553385 : f32
    %22 = vector.broadcast %cst_17 : f32 to vector<16x16xf32>
    %23 = arith.mulf %21, %22 : vector<16x16xf32>
    %24 = arith.addf %23, %5 : vector<16x16xf32>
    %cst_18 = arith.constant dense<0xFF800000> : vector<16xf32>
    %25 = vector.multi_reduction <maximumf>, %24, %cst_18 [1] : vector<16x16xf32> to vector<16xf32>
    %26 = vector.shape_cast %25 : vector<16xf32> to vector<16x1xf32>
    %27 = vector.broadcast %26 : vector<16x1xf32> to vector<16x16xf32>
    %28 = arith.subf %24, %27 : vector<16x16xf32>
    %29 = math.exp %28 : vector<16x16xf32>
    %cst_19 = arith.constant dense<0.000000e+00> : vector<16xf32>
    %30 = vector.multi_reduction <add>, %29, %cst_19 [1] : vector<16x16xf32> to vector<16xf32>
    %31 = vector.shape_cast %30 : vector<16xf32> to vector<16x1xf32>
    %32 = tpu.reciprocal %31 {approx = true} : vector<16x1xf32> -> vector<16x1xf32>
    %33 = vector.broadcast %32 : vector<16x1xf32> to vector<16x16xf32>
    %34 = arith.mulf %29, %33 : vector<16x16xf32>
    %cst_20 = arith.constant dense<0.000000e+00> : vector<16x8xf32>
    %35 = tpu.matmul %34, %19, %cst_20 {dimension_numbers = #tpu.dot_dimension_numbers<[1], [0], [0], [1], [0, 0, 1, 1], [], []>} : vector<16x16xf32>, vector<16x8xf32>, vector<16x8xf32> -> vector<16x8xf32>
    %36 = vector.extract_strided_slice %15 {offsets = [0, 0], sizes = [8, 32], strides = [1, 1]} : vector<32x32xbf16> to vector<8x32xbf16>
    %37 = arith.truncf %35 : vector<16x8xf32> to vector<16x8xbf16>
    %cst_21 = arith.constant dense<0.000000e+00> : vector<16x32xf32>
    %38 = tpu.matmul %37, %36, %cst_21 {dimension_numbers = #tpu.dot_dimension_numbers<[1], [0], [0], [1], [0, 0, 1, 1], [], []>} : vector<16x8xbf16>, vector<8x32xbf16>, vector<16x32xf32> -> vector<16x32xf32>
    %39 = arith.addf %16, %38 : vector<16x32xf32>
    %40 = vector.extract_strided_slice %13 {offsets = [0, 8], sizes = [16, 8], strides = [1, 1]} : vector<16x96xf32> to vector<16x8xf32>
    %41 = vector.extract_strided_slice %13 {offsets = [0, 40], sizes = [16, 8], strides = [1, 1]} : vector<16x96xf32> to vector<16x8xf32>
    %42 = vector.extract_strided_slice %13 {offsets = [0, 72], sizes = [16, 8], strides = [1, 1]} : vector<16x96xf32> to vector<16x8xf32>
    %43 = tpu.transpose %41, [1, 0] : vector<16x8xf32> -> vector<8x16xf32>
    %cst_22 = arith.constant dense<0.000000e+00> : vector<16x16xf32>
    %44 = tpu.matmul %40, %43, %cst_22 {dimension_numbers = #tpu.dot_dimension_numbers<[1], [0], [0], [1], [0, 0, 1, 1], [], []>} : vector<16x8xf32>, vector<8x16xf32>, vector<16x16xf32> -> vector<16x16xf32>
    %cst_23 = arith.constant 0.353553385 : f32
    %45 = vector.broadcast %cst_23 : f32 to vector<16x16xf32>
    %46 = arith.mulf %44, %45 : vector<16x16xf32>
    %47 = arith.addf %46, %5 : vector<16x16xf32>
    %cst_24 = arith.constant dense<0xFF800000> : vector<16xf32>
    %48 = vector.multi_reduction <maximumf>, %47, %cst_24 [1] : vector<16x16xf32> to vector<16xf32>
    %49 = vector.shape_cast %48 : vector<16xf32> to vector<16x1xf32>
    %50 = vector.broadcast %49 : vector<16x1xf32> to vector<16x16xf32>
    %51 = arith.subf %47, %50 : vector<16x16xf32>
    %52 = math.exp %51 : vector<16x16xf32>
    %cst_25 = arith.constant dense<0.000000e+00> : vector<16xf32>
    %53 = vector.multi_reduction <add>, %52, %cst_25 [1] : vector<16x16xf32> to vector<16xf32>
    %54 = vector.shape_cast %53 : vector<16xf32> to vector<16x1xf32>
    %55 = tpu.reciprocal %54 {approx = true} : vector<16x1xf32> -> vector<16x1xf32>
    %56 = vector.broadcast %55 : vector<16x1xf32> to vector<16x16xf32>
    %57 = arith.mulf %52, %56 : vector<16x16xf32>
    %cst_26 = arith.constant dense<0.000000e+00> : vector<16x8xf32>
    %58 = tpu.matmul %57, %42, %cst_26 {dimension_numbers = #tpu.dot_dimension_numbers<[1], [0], [0], [1], [0, 0, 1, 1], [], []>} : vector<16x16xf32>, vector<16x8xf32>, vector<16x8xf32> -> vector<16x8xf32>
    %59 = vector.extract_strided_slice %15 {offsets = [8, 0], sizes = [8, 32], strides = [1, 1]} : vector<32x32xbf16> to vector<8x32xbf16>
    %60 = arith.truncf %58 : vector<16x8xf32> to vector<16x8xbf16>
    %cst_27 = arith.constant dense<0.000000e+00> : vector<16x32xf32>
    %61 = tpu.matmul %60, %59, %cst_27 {dimension_numbers = #tpu.dot_dimension_numbers<[1], [0], [0], [1], [0, 0, 1, 1], [], []>} : vector<16x8xbf16>, vector<8x32xbf16>, vector<16x32xf32> -> vector<16x32xf32>
    %62 = arith.addf %39, %61 : vector<16x32xf32>
    %63 = vector.extract_strided_slice %13 {offsets = [0, 16], sizes = [16, 8], strides = [1, 1]} : vector<16x96xf32> to vector<16x8xf32>
    %64 = vector.extract_strided_slice %13 {offsets = [0, 48], sizes = [16, 8], strides = [1, 1]} : vector<16x96xf32> to vector<16x8xf32>
    %65 = vector.extract_strided_slice %13 {offsets = [0, 80], sizes = [16, 8], strides = [1, 1]} : vector<16x96xf32> to vector<16x8xf32>
    %66 = tpu.transpose %64, [1, 0] : vector<16x8xf32> -> vector<8x16xf32>
    %cst_28 = arith.constant dense<0.000000e+00> : vector<16x16xf32>
    %67 = tpu.matmul %63, %66, %cst_28 {dimension_numbers = #tpu.dot_dimension_numbers<[1], [0], [0], [1], [0, 0, 1, 1], [], []>} : vector<16x8xf32>, vector<8x16xf32>, vector<16x16xf32> -> vector<16x16xf32>
    %cst_29 = arith.constant 0.353553385 : f32
    %68 = vector.broadcast %cst_29 : f32 to vector<16x16xf32>
    %69 = arith.mulf %67, %68 : vector<16x16xf32>
    %70 = arith.addf %69, %5 : vector<16x16xf32>
    %cst_30 = arith.constant dense<0xFF800000> : vector<16xf32>
    %71 = vector.multi_reduction <maximumf>, %70, %cst_30 [1] : vector<16x16xf32> to vector<16xf32>
    %72 = vector.shape_cast %71 : vector<16xf32> to vector<16x1xf32>
    %73 = vector.broadcast %72 : vector<16x1xf32> to vector<16x16xf32>
    %74 = arith.subf %70, %73 : vector<16x16xf32>
    %75 = math.exp %74 : vector<16x16xf32>
    %cst_31 = arith.constant dense<0.000000e+00> : vector<16xf32>
    %76 = vector.multi_reduction <add>, %75, %cst_31 [1] : vector<16x16xf32> to vector<16xf32>
    %77 = vector.shape_cast %76 : vector<16xf32> to vector<16x1xf32>
    %78 = tpu.reciprocal %77 {approx = true} : vector<16x1xf32> -> vector<16x1xf32>
    %79 = vector.broadcast %78 : vector<16x1xf32> to vector<16x16xf32>
    %80 = arith.mulf %75, %79 : vector<16x16xf32>
    %cst_32 = arith.constant dense<0.000000e+00> : vector<16x8xf32>
    %81 = tpu.matmul %80, %65, %cst_32 {dimension_numbers = #tpu.dot_dimension_numbers<[1], [0], [0], [1], [0, 0, 1, 1], [], []>} : vector<16x16xf32>, vector<16x8xf32>, vector<16x8xf32> -> vector<16x8xf32>
    %82 = vector.extract_strided_slice %15 {offsets = [16, 0], sizes = [8, 32], strides = [1, 1]} : vector<32x32xbf16> to vector<8x32xbf16>
    %83 = arith.truncf %81 : vector<16x8xf32> to vector<16x8xbf16>
    %cst_33 = arith.constant dense<0.000000e+00> : vector<16x32xf32>
    %84 = tpu.matmul %83, %82, %cst_33 {dimension_numbers = #tpu.dot_dimension_numbers<[1], [0], [0], [1], [0, 0, 1, 1], [], []>} : vector<16x8xbf16>, vector<8x32xbf16>, vector<16x32xf32> -> vector<16x32xf32>
    %85 = arith.addf %62, %84 : vector<16x32xf32>
    %86 = vector.extract_strided_slice %13 {offsets = [0, 24], sizes = [16, 8], strides = [1, 1]} : vector<16x96xf32> to vector<16x8xf32>
    %87 = vector.extract_strided_slice %13 {offsets = [0, 56], sizes = [16, 8], strides = [1, 1]} : vector<16x96xf32> to vector<16x8xf32>
    %88 = vector.extract_strided_slice %13 {offsets = [0, 88], sizes = [16, 8], strides = [1, 1]} : vector<16x96xf32> to vector<16x8xf32>
    %89 = tpu.transpose %87, [1, 0] : vector<16x8xf32> -> vector<8x16xf32>
    %cst_34 = arith.constant dense<0.000000e+00> : vector<16x16xf32>
    %90 = tpu.matmul %86, %89, %cst_34 {dimension_numbers = #tpu.dot_dimension_numbers<[1], [0], [0], [1], [0, 0, 1, 1], [], []>} : vector<16x8xf32>, vector<8x16xf32>, vector<16x16xf32> -> vector<16x16xf32>
    %cst_35 = arith.constant 0.353553385 : f32
    %91 = vector.broadcast %cst_35 : f32 to vector<16x16xf32>
    %92 = arith.mulf %90, %91 : vector<16x16xf32>
    %93 = arith.addf %92, %5 : vector<16x16xf32>
    %cst_36 = arith.constant dense<0xFF800000> : vector<16xf32>
    %94 = vector.multi_reduction <maximumf>, %93, %cst_36 [1] : vector<16x16xf32> to vector<16xf32>
    %95 = vector.shape_cast %94 : vector<16xf32> to vector<16x1xf32>
    %96 = vector.broadcast %95 : vector<16x1xf32> to vector<16x16xf32>
    %97 = arith.subf %93, %96 : vector<16x16xf32>
    %98 = math.exp %97 : vector<16x16xf32>
    %cst_37 = arith.constant dense<0.000000e+00> : vector<16xf32>
    %99 = vector.multi_reduction <add>, %98, %cst_37 [1] : vector<16x16xf32> to vector<16xf32>
    %100 = vector.shape_cast %99 : vector<16xf32> to vector<16x1xf32>
    %101 = tpu.reciprocal %100 {approx = true} : vector<16x1xf32> -> vector<16x1xf32>
    %102 = vector.broadcast %101 : vector<16x1xf32> to vector<16x16xf32>
    %103 = arith.mulf %98, %102 : vector<16x16xf32>
    %cst_38 = arith.constant dense<0.000000e+00> : vector<16x8xf32>
    %104 = tpu.matmul %103, %88, %cst_38 {dimension_numbers = #tpu.dot_dimension_numbers<[1], [0], [0], [1], [0, 0, 1, 1], [], []>} : vector<16x16xf32>, vector<16x8xf32>, vector<16x8xf32> -> vector<16x8xf32>
    %105 = vector.extract_strided_slice %15 {offsets = [24, 0], sizes = [8, 32], strides = [1, 1]} : vector<32x32xbf16> to vector<8x32xbf16>
    %106 = arith.truncf %104 : vector<16x8xf32> to vector<16x8xbf16>
    %cst_39 = arith.constant dense<0.000000e+00> : vector<16x32xf32>
    %107 = tpu.matmul %106, %105, %cst_39 {dimension_numbers = #tpu.dot_dimension_numbers<[1], [0], [0], [1], [0, 0, 1, 1], [], []>} : vector<16x8xbf16>, vector<8x32xbf16>, vector<16x32xf32> -> vector<16x32xf32>
    %108 = arith.addf %85, %107 : vector<16x32xf32>
    %c0_40 = arith.constant 0 : index
    %c0_41 = arith.constant 0 : index
    %c0_42 = arith.constant 0 : index
    %109 = vector.load %arg6[%c0_40, %c0_41, %c0_42] : memref<2x1x32xf32, #tpu.memory_space<vmem>>, vector<1x1x32xf32>
    %110 = vector.shape_cast %109 : vector<1x1x32xf32> to vector<1x32xf32>
    %111 = vector.broadcast %110 : vector<1x32xf32> to vector<16x32xf32>
    %112 = arith.addf %108, %111 : vector<16x32xf32>
    %113 = arith.addf %4, %112 : vector<16x32xf32>
    %c0_43 = arith.constant 0 : index
    %c0_44 = arith.constant 0 : index
    %c0_45 = arith.constant 0 : index
    %114 = vector.load %arg7[%c0_43, %c0_44, %c0_45] : memref<2x1x32xf32, #tpu.memory_space<vmem>>, vector<1x1x32xf32>
    %115 = vector.shape_cast %114 : vector<1x1x32xf32> to vector<1x32xf32>
    %c0_46 = arith.constant 0 : index
    %c0_47 = arith.constant 0 : index
    %c0_48 = arith.constant 0 : index
    %116 = vector.load %arg8[%c0_46, %c0_47, %c0_48] : memref<2x1x32xf32, #tpu.memory_space<vmem>>, vector<1x1x32xf32>
    %117 = vector.shape_cast %116 : vector<1x1x32xf32> to vector<1x32xf32>
    %cst_49 = arith.constant dense<0.000000e+00> : vector<16xf32>
    %118 = vector.multi_reduction <add>, %113, %cst_49 [1] : vector<16x32xf32> to vector<16xf32>
    %119 = vector.shape_cast %118 : vector<16xf32> to vector<16x1xf32>
    %cst_50 = arith.constant 3.200000e+01 : f32
    %120 = vector.broadcast %cst_50 : f32 to vector<16x1xf32>
    %121 = arith.divf %119, %120 : vector<16x1xf32>
    %122 = vector.broadcast %121 : vector<16x1xf32> to vector<16x32xf32>
    %123 = arith.subf %113, %122 : vector<16x32xf32>
    %124 = arith.mulf %123, %123 : vector<16x32xf32>
    %cst_51 = arith.constant dense<0.000000e+00> : vector<16xf32>
    %125 = vector.multi_reduction <add>, %124, %cst_51 [1] : vector<16x32xf32> to vector<16xf32>
    %126 = vector.shape_cast %125 : vector<16xf32> to vector<16x1xf32>
    %cst_52 = arith.constant 3.200000e+01 : f32
    %127 = vector.broadcast %cst_52 : f32 to vector<16x1xf32>
    %128 = arith.divf %126, %127 : vector<16x1xf32>
    %129 = vector.broadcast %121 : vector<16x1xf32> to vector<16x32xf32>
    %130 = arith.subf %113, %129 : vector<16x32xf32>
    %cst_53 = arith.constant 9.99999974E-6 : f32
    %131 = vector.broadcast %cst_53 : f32 to vector<16x1xf32>
    %132 = arith.addf %128, %131 : vector<16x1xf32>
    %133 = math.rsqrt %132 : vector<16x1xf32>
    %134 = vector.broadcast %133 : vector<16x1xf32> to vector<16x32xf32>
    %135 = arith.mulf %130, %134 : vector<16x32xf32>
    %136 = vector.broadcast %115 : vector<1x32xf32> to vector<16x32xf32>
    %137 = arith.mulf %135, %136 : vector<16x32xf32>
    %138 = vector.broadcast %117 : vector<1x32xf32> to vector<16x32xf32>
    %139 = arith.addf %137, %138 : vector<16x32xf32>
    %140 = arith.truncf %139 : vector<16x32xf32> to vector<16x32xbf16>
    %c0_54 = arith.constant 0 : index
    %c0_55 = arith.constant 0 : index
    %c0_56 = arith.constant 0 : index
    %141 = vector.load %arg9[%c0_54, %c0_55, %c0_56] : memref<2x32x64xbf16, #tpu.memory_space<vmem>>, vector<1x32x64xbf16>
    %142 = vector.shape_cast %141 : vector<1x32x64xbf16> to vector<32x64xbf16>
    %cst_57 = arith.constant dense<0.000000e+00> : vector<16x64xf32>
    %143 = tpu.matmul %140, %142, %cst_57 {dimension_numbers = #tpu.dot_dimension_numbers<[1], [0], [0], [1], [0, 0, 1, 1], [], []>} : vector<16x32xbf16>, vector<32x64xbf16>, vector<16x64xf32> -> vector<16x64xf32>
    %c0_58 = arith.constant 0 : index
    %c0_59 = arith.constant 0 : index
    %c0_60 = arith.constant 0 : index
    %144 = vector.load %arg10[%c0_58, %c0_59, %c0_60] : memref<2x1x64xf32, #tpu.memory_space<vmem>>, vector<1x1x64xf32>
    %145 = vector.shape_cast %144 : vector<1x1x64xf32> to vector<1x64xf32>
    %146 = vector.broadcast %145 : vector<1x64xf32> to vector<16x64xf32>
    %147 = arith.addf %143, %146 : vector<16x64xf32>
    %cst_61 = arith.constant 0.000000e+00 : f32
    %148 = vector.broadcast %cst_61 : f32 to vector<16x64xf32>
    %149 = arith.maximumf %147, %148 : vector<16x64xf32>
    %150 = arith.truncf %149 : vector<16x64xf32> to vector<16x64xbf16>
    %c0_62 = arith.constant 0 : index
    %c0_63 = arith.constant 0 : index
    %c0_64 = arith.constant 0 : index
    %151 = vector.load %arg11[%c0_62, %c0_63, %c0_64] : memref<2x64x32xbf16, #tpu.memory_space<vmem>>, vector<1x64x32xbf16>
    %152 = vector.shape_cast %151 : vector<1x64x32xbf16> to vector<64x32xbf16>
    %cst_65 = arith.constant dense<0.000000e+00> : vector<16x32xf32>
    %153 = tpu.matmul %150, %152, %cst_65 {dimension_numbers = #tpu.dot_dimension_numbers<[1], [0], [0], [1], [0, 0, 1, 1], [], []>} : vector<16x64xbf16>, vector<64x32xbf16>, vector<16x32xf32> -> vector<16x32xf32>
    %c0_66 = arith.constant 0 : index
    %c0_67 = arith.constant 0 : index
    %c0_68 = arith.constant 0 : index
    %154 = vector.load %arg12[%c0_66, %c0_67, %c0_68] : memref<2x1x32xf32, #tpu.memory_space<vmem>>, vector<1x1x32xf32>
    %155 = vector.shape_cast %154 : vector<1x1x32xf32> to vector<1x32xf32>
    %156 = vector.broadcast %155 : vector<1x32xf32> to vector<16x32xf32>
    %157 = arith.addf %153, %156 : vector<16x32xf32>
    %158 = arith.addf %139, %157 : vector<16x32xf32>
    %c0_69 = arith.constant 0 : index
    %c0_70 = arith.constant 0 : index
    %c0_71 = arith.constant 0 : index
    %159 = vector.load %arg13[%c0_69, %c0_70, %c0_71] : memref<2x1x32xf32, #tpu.memory_space<vmem>>, vector<1x1x32xf32>
    %160 = vector.shape_cast %159 : vector<1x1x32xf32> to vector<1x32xf32>
    %c0_72 = arith.constant 0 : index
    %c0_73 = arith.constant 0 : index
    %c0_74 = arith.constant 0 : index
    %161 = vector.load %arg14[%c0_72, %c0_73, %c0_74] : memref<2x1x32xf32, #tpu.memory_space<vmem>>, vector<1x1x32xf32>
    %162 = vector.shape_cast %161 : vector<1x1x32xf32> to vector<1x32xf32>
    %cst_75 = arith.constant dense<0.000000e+00> : vector<16xf32>
    %163 = vector.multi_reduction <add>, %158, %cst_75 [1] : vector<16x32xf32> to vector<16xf32>
    %164 = vector.shape_cast %163 : vector<16xf32> to vector<16x1xf32>
    %cst_76 = arith.constant 3.200000e+01 : f32
    %165 = vector.broadcast %cst_76 : f32 to vector<16x1xf32>
    %166 = arith.divf %164, %165 : vector<16x1xf32>
    %167 = vector.broadcast %166 : vector<16x1xf32> to vector<16x32xf32>
    %168 = arith.subf %158, %167 : vector<16x32xf32>
    %169 = arith.mulf %168, %168 : vector<16x32xf32>
    %cst_77 = arith.constant dense<0.000000e+00> : vector<16xf32>
    %170 = vector.multi_reduction <add>, %169, %cst_77 [1] : vector<16x32xf32> to vector<16xf32>
    %171 = vector.shape_cast %170 : vector<16xf32> to vector<16x1xf32>
    %cst_78 = arith.constant 3.200000e+01 : f32
    %172 = vector.broadcast %cst_78 : f32 to vector<16x1xf32>
    %173 = arith.divf %171, %172 : vector<16x1xf32>
    %174 = vector.broadcast %166 : vector<16x1xf32> to vector<16x32xf32>
    %175 = arith.subf %158, %174 : vector<16x32xf32>
    %cst_79 = arith.constant 9.99999974E-6 : f32
    %176 = vector.broadcast %cst_79 : f32 to vector<16x1xf32>
    %177 = arith.addf %173, %176 : vector<16x1xf32>
    %178 = math.rsqrt %177 : vector<16x1xf32>
    %179 = vector.broadcast %178 : vector<16x1xf32> to vector<16x32xf32>
    %180 = arith.mulf %175, %179 : vector<16x32xf32>
    %181 = vector.broadcast %160 : vector<1x32xf32> to vector<16x32xf32>
    %182 = arith.mulf %180, %181 : vector<16x32xf32>
    %183 = vector.broadcast %162 : vector<1x32xf32> to vector<16x32xf32>
    %184 = arith.addf %182, %183 : vector<16x32xf32>
    %185 = arith.truncf %184 : vector<16x32xf32> to vector<16x32xbf16>
    %c1 = arith.constant 1 : index
    %c0_80 = arith.constant 0 : index
    %c0_81 = arith.constant 0 : index
    %186 = vector.load %arg3[%c1, %c0_80, %c0_81] : memref<2x32x96xbf16, #tpu.memory_space<vmem>>, vector<1x32x96xbf16>
    %187 = vector.shape_cast %186 : vector<1x32x96xbf16> to vector<32x96xbf16>
    %cst_82 = arith.constant dense<0.000000e+00> : vector<16x96xf32>
    %188 = tpu.matmul %185, %187, %cst_82 {dimension_numbers = #tpu.dot_dimension_numbers<[1], [0], [0], [1], [0, 0, 1, 1], [], []>} : vector<16x32xbf16>, vector<32x96xbf16>, vector<16x96xf32> -> vector<16x96xf32>
    %c1_83 = arith.constant 1 : index
    %c0_84 = arith.constant 0 : index
    %c0_85 = arith.constant 0 : index
    %189 = vector.load %arg4[%c1_83, %c0_84, %c0_85] : memref<2x1x96xf32, #tpu.memory_space<vmem>>, vector<1x1x96xf32>
    %190 = vector.shape_cast %189 : vector<1x1x96xf32> to vector<1x96xf32>
    %191 = vector.broadcast %190 : vector<1x96xf32> to vector<16x96xf32>
    %192 = arith.addf %188, %191 : vector<16x96xf32>
    %c1_86 = arith.constant 1 : index
    %c0_87 = arith.constant 0 : index
    %c0_88 = arith.constant 0 : index
    %193 = vector.load %arg5[%c1_86, %c0_87, %c0_88] : memref<2x32x32xbf16, #tpu.memory_space<vmem>>, vector<1x32x32xbf16>
    %194 = vector.shape_cast %193 : vector<1x32x32xbf16> to vector<32x32xbf16>
    %cst_89 = arith.constant 0.000000e+00 : f32
    %195 = vector.broadcast %cst_89 : f32 to vector<16x32xf32>
    %196 = vector.extract_strided_slice %192 {offsets = [0, 0], sizes = [16, 8], strides = [1, 1]} : vector<16x96xf32> to vector<16x8xf32>
    %197 = vector.extract_strided_slice %192 {offsets = [0, 32], sizes = [16, 8], strides = [1, 1]} : vector<16x96xf32> to vector<16x8xf32>
    %198 = vector.extract_strided_slice %192 {offsets = [0, 64], sizes = [16, 8], strides = [1, 1]} : vector<16x96xf32> to vector<16x8xf32>
    %199 = tpu.transpose %197, [1, 0] : vector<16x8xf32> -> vector<8x16xf32>
    %cst_90 = arith.constant dense<0.000000e+00> : vector<16x16xf32>
    %200 = tpu.matmul %196, %199, %cst_90 {dimension_numbers = #tpu.dot_dimension_numbers<[1], [0], [0], [1], [0, 0, 1, 1], [], []>} : vector<16x8xf32>, vector<8x16xf32>, vector<16x16xf32> -> vector<16x16xf32>
    %cst_91 = arith.constant 0.353553385 : f32
    %201 = vector.broadcast %cst_91 : f32 to vector<16x16xf32>
    %202 = arith.mulf %200, %201 : vector<16x16xf32>
    %203 = arith.addf %202, %5 : vector<16x16xf32>
    %cst_92 = arith.constant dense<0xFF800000> : vector<16xf32>
    %204 = vector.multi_reduction <maximumf>, %203, %cst_92 [1] : vector<16x16xf32> to vector<16xf32>
    %205 = vector.shape_cast %204 : vector<16xf32> to vector<16x1xf32>
    %206 = vector.broadcast %205 : vector<16x1xf32> to vector<16x16xf32>
    %207 = arith.subf %203, %206 : vector<16x16xf32>
    %208 = math.exp %207 : vector<16x16xf32>
    %cst_93 = arith.constant dense<0.000000e+00> : vector<16xf32>
    %209 = vector.multi_reduction <add>, %208, %cst_93 [1] : vector<16x16xf32> to vector<16xf32>
    %210 = vector.shape_cast %209 : vector<16xf32> to vector<16x1xf32>
    %211 = tpu.reciprocal %210 {approx = true} : vector<16x1xf32> -> vector<16x1xf32>
    %212 = vector.broadcast %211 : vector<16x1xf32> to vector<16x16xf32>
    %213 = arith.mulf %208, %212 : vector<16x16xf32>
    %cst_94 = arith.constant dense<0.000000e+00> : vector<16x8xf32>
    %214 = tpu.matmul %213, %198, %cst_94 {dimension_numbers = #tpu.dot_dimension_numbers<[1], [0], [0], [1], [0, 0, 1, 1], [], []>} : vector<16x16xf32>, vector<16x8xf32>, vector<16x8xf32> -> vector<16x8xf32>
    %215 = vector.extract_strided_slice %194 {offsets = [0, 0], sizes = [8, 32], strides = [1, 1]} : vector<32x32xbf16> to vector<8x32xbf16>
    %216 = arith.truncf %214 : vector<16x8xf32> to vector<16x8xbf16>
    %cst_95 = arith.constant dense<0.000000e+00> : vector<16x32xf32>
    %217 = tpu.matmul %216, %215, %cst_95 {dimension_numbers = #tpu.dot_dimension_numbers<[1], [0], [0], [1], [0, 0, 1, 1], [], []>} : vector<16x8xbf16>, vector<8x32xbf16>, vector<16x32xf32> -> vector<16x32xf32>
    %218 = arith.addf %195, %217 : vector<16x32xf32>
    %219 = vector.extract_strided_slice %192 {offsets = [0, 8], sizes = [16, 8], strides = [1, 1]} : vector<16x96xf32> to vector<16x8xf32>
    %220 = vector.extract_strided_slice %192 {offsets = [0, 40], sizes = [16, 8], strides = [1, 1]} : vector<16x96xf32> to vector<16x8xf32>
    %221 = vector.extract_strided_slice %192 {offsets = [0, 72], sizes = [16, 8], strides = [1, 1]} : vector<16x96xf32> to vector<16x8xf32>
    %222 = tpu.transpose %220, [1, 0] : vector<16x8xf32> -> vector<8x16xf32>
    %cst_96 = arith.constant dense<0.000000e+00> : vector<16x16xf32>
    %223 = tpu.matmul %219, %222, %cst_96 {dimension_numbers = #tpu.dot_dimension_numbers<[1], [0], [0], [1], [0, 0, 1, 1], [], []>} : vector<16x8xf32>, vector<8x16xf32>, vector<16x16xf32> -> vector<16x16xf32>
    %cst_97 = arith.constant 0.353553385 : f32
    %224 = vector.broadcast %cst_97 : f32 to vector<16x16xf32>
    %225 = arith.mulf %223, %224 : vector<16x16xf32>
    %226 = arith.addf %225, %5 : vector<16x16xf32>
    %cst_98 = arith.constant dense<0xFF800000> : vector<16xf32>
    %227 = vector.multi_reduction <maximumf>, %226, %cst_98 [1] : vector<16x16xf32> to vector<16xf32>
    %228 = vector.shape_cast %227 : vector<16xf32> to vector<16x1xf32>
    %229 = vector.broadcast %228 : vector<16x1xf32> to vector<16x16xf32>
    %230 = arith.subf %226, %229 : vector<16x16xf32>
    %231 = math.exp %230 : vector<16x16xf32>
    %cst_99 = arith.constant dense<0.000000e+00> : vector<16xf32>
    %232 = vector.multi_reduction <add>, %231, %cst_99 [1] : vector<16x16xf32> to vector<16xf32>
    %233 = vector.shape_cast %232 : vector<16xf32> to vector<16x1xf32>
    %234 = tpu.reciprocal %233 {approx = true} : vector<16x1xf32> -> vector<16x1xf32>
    %235 = vector.broadcast %234 : vector<16x1xf32> to vector<16x16xf32>
    %236 = arith.mulf %231, %235 : vector<16x16xf32>
    %cst_100 = arith.constant dense<0.000000e+00> : vector<16x8xf32>
    %237 = tpu.matmul %236, %221, %cst_100 {dimension_numbers = #tpu.dot_dimension_numbers<[1], [0], [0], [1], [0, 0, 1, 1], [], []>} : vector<16x16xf32>, vector<16x8xf32>, vector<16x8xf32> -> vector<16x8xf32>
    %238 = vector.extract_strided_slice %194 {offsets = [8, 0], sizes = [8, 32], strides = [1, 1]} : vector<32x32xbf16> to vector<8x32xbf16>
    %239 = arith.truncf %237 : vector<16x8xf32> to vector<16x8xbf16>
    %cst_101 = arith.constant dense<0.000000e+00> : vector<16x32xf32>
    %240 = tpu.matmul %239, %238, %cst_101 {dimension_numbers = #tpu.dot_dimension_numbers<[1], [0], [0], [1], [0, 0, 1, 1], [], []>} : vector<16x8xbf16>, vector<8x32xbf16>, vector<16x32xf32> -> vector<16x32xf32>
    %241 = arith.addf %218, %240 : vector<16x32xf32>
    %242 = vector.extract_strided_slice %192 {offsets = [0, 16], sizes = [16, 8], strides = [1, 1]} : vector<16x96xf32> to vector<16x8xf32>
    %243 = vector.extract_strided_slice %192 {offsets = [0, 48], sizes = [16, 8], strides = [1, 1]} : vector<16x96xf32> to vector<16x8xf32>
    %244 = vector.extract_strided_slice %192 {offsets = [0, 80], sizes = [16, 8], strides = [1, 1]} : vector<16x96xf32> to vector<16x8xf32>
    %245 = tpu.transpose %243, [1, 0] : vector<16x8xf32> -> vector<8x16xf32>
    %cst_102 = arith.constant dense<0.000000e+00> : vector<16x16xf32>
    %246 = tpu.matmul %242, %245, %cst_102 {dimension_numbers = #tpu.dot_dimension_numbers<[1], [0], [0], [1], [0, 0, 1, 1], [], []>} : vector<16x8xf32>, vector<8x16xf32>, vector<16x16xf32> -> vector<16x16xf32>
    %cst_103 = arith.constant 0.353553385 : f32
    %247 = vector.broadcast %cst_103 : f32 to vector<16x16xf32>
    %248 = arith.mulf %246, %247 : vector<16x16xf32>
    %249 = arith.addf %248, %5 : vector<16x16xf32>
    %cst_104 = arith.constant dense<0xFF800000> : vector<16xf32>
    %250 = vector.multi_reduction <maximumf>, %249, %cst_104 [1] : vector<16x16xf32> to vector<16xf32>
    %251 = vector.shape_cast %250 : vector<16xf32> to vector<16x1xf32>
    %252 = vector.broadcast %251 : vector<16x1xf32> to vector<16x16xf32>
    %253 = arith.subf %249, %252 : vector<16x16xf32>
    %254 = math.exp %253 : vector<16x16xf32>
    %cst_105 = arith.constant dense<0.000000e+00> : vector<16xf32>
    %255 = vector.multi_reduction <add>, %254, %cst_105 [1] : vector<16x16xf32> to vector<16xf32>
    %256 = vector.shape_cast %255 : vector<16xf32> to vector<16x1xf32>
    %257 = tpu.reciprocal %256 {approx = true} : vector<16x1xf32> -> vector<16x1xf32>
    %258 = vector.broadcast %257 : vector<16x1xf32> to vector<16x16xf32>
    %259 = arith.mulf %254, %258 : vector<16x16xf32>
    %cst_106 = arith.constant dense<0.000000e+00> : vector<16x8xf32>
    %260 = tpu.matmul %259, %244, %cst_106 {dimension_numbers = #tpu.dot_dimension_numbers<[1], [0], [0], [1], [0, 0, 1, 1], [], []>} : vector<16x16xf32>, vector<16x8xf32>, vector<16x8xf32> -> vector<16x8xf32>
    %261 = vector.extract_strided_slice %194 {offsets = [16, 0], sizes = [8, 32], strides = [1, 1]} : vector<32x32xbf16> to vector<8x32xbf16>
    %262 = arith.truncf %260 : vector<16x8xf32> to vector<16x8xbf16>
    %cst_107 = arith.constant dense<0.000000e+00> : vector<16x32xf32>
    %263 = tpu.matmul %262, %261, %cst_107 {dimension_numbers = #tpu.dot_dimension_numbers<[1], [0], [0], [1], [0, 0, 1, 1], [], []>} : vector<16x8xbf16>, vector<8x32xbf16>, vector<16x32xf32> -> vector<16x32xf32>
    %264 = arith.addf %241, %263 : vector<16x32xf32>
    %265 = vector.extract_strided_slice %192 {offsets = [0, 24], sizes = [16, 8], strides = [1, 1]} : vector<16x96xf32> to vector<16x8xf32>
    %266 = vector.extract_strided_slice %192 {offsets = [0, 56], sizes = [16, 8], strides = [1, 1]} : vector<16x96xf32> to vector<16x8xf32>
    %267 = vector.extract_strided_slice %192 {offsets = [0, 88], sizes = [16, 8], strides = [1, 1]} : vector<16x96xf32> to vector<16x8xf32>
    %268 = tpu.transpose %266, [1, 0] : vector<16x8xf32> -> vector<8x16xf32>
    %cst_108 = arith.constant dense<0.000000e+00> : vector<16x16xf32>
    %269 = tpu.matmul %265, %268, %cst_108 {dimension_numbers = #tpu.dot_dimension_numbers<[1], [0], [0], [1], [0, 0, 1, 1], [], []>} : vector<16x8xf32>, vector<8x16xf32>, vector<16x16xf32> -> vector<16x16xf32>
    %cst_109 = arith.constant 0.353553385 : f32
    %270 = vector.broadcast %cst_109 : f32 to vector<16x16xf32>
    %271 = arith.mulf %269, %270 : vector<16x16xf32>
    %272 = arith.addf %271, %5 : vector<16x16xf32>
    %cst_110 = arith.constant dense<0xFF800000> : vector<16xf32>
    %273 = vector.multi_reduction <maximumf>, %272, %cst_110 [1] : vector<16x16xf32> to vector<16xf32>
    %274 = vector.shape_cast %273 : vector<16xf32> to vector<16x1xf32>
    %275 = vector.broadcast %274 : vector<16x1xf32> to vector<16x16xf32>
    %276 = arith.subf %272, %275 : vector<16x16xf32>
    %277 = math.exp %276 : vector<16x16xf32>
    %cst_111 = arith.constant dense<0.000000e+00> : vector<16xf32>
    %278 = vector.multi_reduction <add>, %277, %cst_111 [1] : vector<16x16xf32> to vector<16xf32>
    %279 = vector.shape_cast %278 : vector<16xf32> to vector<16x1xf32>
    %280 = tpu.reciprocal %279 {approx = true} : vector<16x1xf32> -> vector<16x1xf32>
    %281 = vector.broadcast %280 : vector<16x1xf32> to vector<16x16xf32>
    %282 = arith.mulf %277, %281 : vector<16x16xf32>
    %cst_112 = arith.constant dense<0.000000e+00> : vector<16x8xf32>
    %283 = tpu.matmul %282, %267, %cst_112 {dimension_numbers = #tpu.dot_dimension_numbers<[1], [0], [0], [1], [0, 0, 1, 1], [], []>} : vector<16x16xf32>, vector<16x8xf32>, vector<16x8xf32> -> vector<16x8xf32>
    %284 = vector.extract_strided_slice %194 {offsets = [24, 0], sizes = [8, 32], strides = [1, 1]} : vector<32x32xbf16> to vector<8x32xbf16>
    %285 = arith.truncf %283 : vector<16x8xf32> to vector<16x8xbf16>
    %cst_113 = arith.constant dense<0.000000e+00> : vector<16x32xf32>
    %286 = tpu.matmul %285, %284, %cst_113 {dimension_numbers = #tpu.dot_dimension_numbers<[1], [0], [0], [1], [0, 0, 1, 1], [], []>} : vector<16x8xbf16>, vector<8x32xbf16>, vector<16x32xf32> -> vector<16x32xf32>
    %287 = arith.addf %264, %286 : vector<16x32xf32>
    %c1_114 = arith.constant 1 : index
    %c0_115 = arith.constant 0 : index
    %c0_116 = arith.constant 0 : index
    %288 = vector.load %arg6[%c1_114, %c0_115, %c0_116] : memref<2x1x32xf32, #tpu.memory_space<vmem>>, vector<1x1x32xf32>
    %289 = vector.shape_cast %288 : vector<1x1x32xf32> to vector<1x32xf32>
    %290 = vector.broadcast %289 : vector<1x32xf32> to vector<16x32xf32>
    %291 = arith.addf %287, %290 : vector<16x32xf32>
    %292 = arith.addf %184, %291 : vector<16x32xf32>
    %c1_117 = arith.constant 1 : index
    %c0_118 = arith.constant 0 : index
    %c0_119 = arith.constant 0 : index
    %293 = vector.load %arg7[%c1_117, %c0_118, %c0_119] : memref<2x1x32xf32, #tpu.memory_space<vmem>>, vector<1x1x32xf32>
    %294 = vector.shape_cast %293 : vector<1x1x32xf32> to vector<1x32xf32>
    %c1_120 = arith.constant 1 : index
    %c0_121 = arith.constant 0 : index
    %c0_122 = arith.constant 0 : index
    %295 = vector.load %arg8[%c1_120, %c0_121, %c0_122] : memref<2x1x32xf32, #tpu.memory_space<vmem>>, vector<1x1x32xf32>
    %296 = vector.shape_cast %295 : vector<1x1x32xf32> to vector<1x32xf32>
    %cst_123 = arith.constant dense<0.000000e+00> : vector<16xf32>
    %297 = vector.multi_reduction <add>, %292, %cst_123 [1] : vector<16x32xf32> to vector<16xf32>
    %298 = vector.shape_cast %297 : vector<16xf32> to vector<16x1xf32>
    %cst_124 = arith.constant 3.200000e+01 : f32
    %299 = vector.broadcast %cst_124 : f32 to vector<16x1xf32>
    %300 = arith.divf %298, %299 : vector<16x1xf32>
    %301 = vector.broadcast %300 : vector<16x1xf32> to vector<16x32xf32>
    %302 = arith.subf %292, %301 : vector<16x32xf32>
    %303 = arith.mulf %302, %302 : vector<16x32xf32>
    %cst_125 = arith.constant dense<0.000000e+00> : vector<16xf32>
    %304 = vector.multi_reduction <add>, %303, %cst_125 [1] : vector<16x32xf32> to vector<16xf32>
    %305 = vector.shape_cast %304 : vector<16xf32> to vector<16x1xf32>
    %cst_126 = arith.constant 3.200000e+01 : f32
    %306 = vector.broadcast %cst_126 : f32 to vector<16x1xf32>
    %307 = arith.divf %305, %306 : vector<16x1xf32>
    %308 = vector.broadcast %300 : vector<16x1xf32> to vector<16x32xf32>
    %309 = arith.subf %292, %308 : vector<16x32xf32>
    %cst_127 = arith.constant 9.99999974E-6 : f32
    %310 = vector.broadcast %cst_127 : f32 to vector<16x1xf32>
    %311 = arith.addf %307, %310 : vector<16x1xf32>
    %312 = math.rsqrt %311 : vector<16x1xf32>
    %313 = vector.broadcast %312 : vector<16x1xf32> to vector<16x32xf32>
    %314 = arith.mulf %309, %313 : vector<16x32xf32>
    %315 = vector.broadcast %294 : vector<1x32xf32> to vector<16x32xf32>
    %316 = arith.mulf %314, %315 : vector<16x32xf32>
    %317 = vector.broadcast %296 : vector<1x32xf32> to vector<16x32xf32>
    %318 = arith.addf %316, %317 : vector<16x32xf32>
    %319 = arith.truncf %318 : vector<16x32xf32> to vector<16x32xbf16>
    %c1_128 = arith.constant 1 : index
    %c0_129 = arith.constant 0 : index
    %c0_130 = arith.constant 0 : index
    %320 = vector.load %arg9[%c1_128, %c0_129, %c0_130] : memref<2x32x64xbf16, #tpu.memory_space<vmem>>, vector<1x32x64xbf16>
    %321 = vector.shape_cast %320 : vector<1x32x64xbf16> to vector<32x64xbf16>
    %cst_131 = arith.constant dense<0.000000e+00> : vector<16x64xf32>
    %322 = tpu.matmul %319, %321, %cst_131 {dimension_numbers = #tpu.dot_dimension_numbers<[1], [0], [0], [1], [0, 0, 1, 1], [], []>} : vector<16x32xbf16>, vector<32x64xbf16>, vector<16x64xf32> -> vector<16x64xf32>
    %c1_132 = arith.constant 1 : index
    %c0_133 = arith.constant 0 : index
    %c0_134 = arith.constant 0 : index
    %323 = vector.load %arg10[%c1_132, %c0_133, %c0_134] : memref<2x1x64xf32, #tpu.memory_space<vmem>>, vector<1x1x64xf32>
    %324 = vector.shape_cast %323 : vector<1x1x64xf32> to vector<1x64xf32>
    %325 = vector.broadcast %324 : vector<1x64xf32> to vector<16x64xf32>
    %326 = arith.addf %322, %325 : vector<16x64xf32>
    %cst_135 = arith.constant 0.000000e+00 : f32
    %327 = vector.broadcast %cst_135 : f32 to vector<16x64xf32>
    %328 = arith.maximumf %326, %327 : vector<16x64xf32>
    %329 = arith.truncf %328 : vector<16x64xf32> to vector<16x64xbf16>
    %c1_136 = arith.constant 1 : index
    %c0_137 = arith.constant 0 : index
    %c0_138 = arith.constant 0 : index
    %330 = vector.load %arg11[%c1_136, %c0_137, %c0_138] : memref<2x64x32xbf16, #tpu.memory_space<vmem>>, vector<1x64x32xbf16>
    %331 = vector.shape_cast %330 : vector<1x64x32xbf16> to vector<64x32xbf16>
    %cst_139 = arith.constant dense<0.000000e+00> : vector<16x32xf32>
    %332 = tpu.matmul %329, %331, %cst_139 {dimension_numbers = #tpu.dot_dimension_numbers<[1], [0], [0], [1], [0, 0, 1, 1], [], []>} : vector<16x64xbf16>, vector<64x32xbf16>, vector<16x32xf32> -> vector<16x32xf32>
    %c1_140 = arith.constant 1 : index
    %c0_141 = arith.constant 0 : index
    %c0_142 = arith.constant 0 : index
    %333 = vector.load %arg12[%c1_140, %c0_141, %c0_142] : memref<2x1x32xf32, #tpu.memory_space<vmem>>, vector<1x1x32xf32>
    %334 = vector.shape_cast %333 : vector<1x1x32xf32> to vector<1x32xf32>
    %335 = vector.broadcast %334 : vector<1x32xf32> to vector<16x32xf32>
    %336 = arith.addf %332, %335 : vector<16x32xf32>
    %337 = arith.addf %318, %336 : vector<16x32xf32>
    %c1_143 = arith.constant 1 : index
    %c0_144 = arith.constant 0 : index
    %c0_145 = arith.constant 0 : index
    %338 = vector.load %arg13[%c1_143, %c0_144, %c0_145] : memref<2x1x32xf32, #tpu.memory_space<vmem>>, vector<1x1x32xf32>
    %339 = vector.shape_cast %338 : vector<1x1x32xf32> to vector<1x32xf32>
    %c1_146 = arith.constant 1 : index
    %c0_147 = arith.constant 0 : index
    %c0_148 = arith.constant 0 : index
    %340 = vector.load %arg14[%c1_146, %c0_147, %c0_148] : memref<2x1x32xf32, #tpu.memory_space<vmem>>, vector<1x1x32xf32>
    %341 = vector.shape_cast %340 : vector<1x1x32xf32> to vector<1x32xf32>
    %cst_149 = arith.constant dense<0.000000e+00> : vector<16xf32>
    %342 = vector.multi_reduction <add>, %337, %cst_149 [1] : vector<16x32xf32> to vector<16xf32>
    %343 = vector.shape_cast %342 : vector<16xf32> to vector<16x1xf32>
    %cst_150 = arith.constant 3.200000e+01 : f32
    %344 = vector.broadcast %cst_150 : f32 to vector<16x1xf32>
    %345 = arith.divf %343, %344 : vector<16x1xf32>
    %346 = vector.broadcast %345 : vector<16x1xf32> to vector<16x32xf32>
    %347 = arith.subf %337, %346 : vector<16x32xf32>
    %348 = arith.mulf %347, %347 : vector<16x32xf32>
    %cst_151 = arith.constant dense<0.000000e+00> : vector<16xf32>
    %349 = vector.multi_reduction <add>, %348, %cst_151 [1] : vector<16x32xf32> to vector<16xf32>
    %350 = vector.shape_cast %349 : vector<16xf32> to vector<16x1xf32>
    %cst_152 = arith.constant 3.200000e+01 : f32
    %351 = vector.broadcast %cst_152 : f32 to vector<16x1xf32>
    %352 = arith.divf %350, %351 : vector<16x1xf32>
    %353 = vector.broadcast %345 : vector<16x1xf32> to vector<16x32xf32>
    %354 = arith.subf %337, %353 : vector<16x32xf32>
    %cst_153 = arith.constant 9.99999974E-6 : f32
    %355 = vector.broadcast %cst_153 : f32 to vector<16x1xf32>
    %356 = arith.addf %352, %355 : vector<16x1xf32>
    %357 = math.rsqrt %356 : vector<16x1xf32>
    %358 = vector.broadcast %357 : vector<16x1xf32> to vector<16x32xf32>
    %359 = arith.mulf %354, %358 : vector<16x32xf32>
    %360 = vector.broadcast %339 : vector<1x32xf32> to vector<16x32xf32>
    %361 = arith.mulf %359, %360 : vector<16x32xf32>
    %362 = vector.broadcast %341 : vector<1x32xf32> to vector<16x32xf32>
    %363 = arith.addf %361, %362 : vector<16x32xf32>
    %c0_154 = arith.constant 0 : index
    %c0_155 = arith.constant 0 : index
    %364 = vector.load %arg15[%c0_154, %c0_155] : memref<16x32xf32, #tpu.memory_space<vmem>>, vector<16x32xf32>
    tpu.vector_store %arg15[%c0_154, %c0_155], %363 {strides = array<i32>} : memref<16x32xf32, #tpu.memory_space<vmem>>, vector<16x32xf32>,
    return
  }
}

</mosaic_0001>

<bundles_post_ra>
// kernel: encoder_forward.1
= control target key start
LH: loop header
LB: loop body
LE: loop exit
PB: predicated region body
PF: predicated region fallthrough
CT: control target
= control target key end

     0   :  { %v3510_v1 = vmov 0.0   ;;  %vm3511_vm0 = vmmov 0   ;;  %vm86_vm1 = vcmask 261120   ;;  %s4084_s0 = inlined_call_operand.vmem [shape: f32[16,32], index: 0, kind: input, shape index: {}]   ;;  %s4085_s1 = inlined_call_operand.vmem [shape: f32[16,32], index: 1, kind: input, shape index: {}]   ;;  %s4086_s2 = inlined_call_operand.vmem [shape: f32[16,16], index: 2, kind: input, shape index: {}]   ;;  %s4087_s3 = inlined_call_operand.vmem [shape: bf16[2,32,96], index: 3, kind: input, shape index: {}]   ;;  %s4088_s4 = inlined_call_operand.vmem [shape: f32[2,1,96], index: 4, kind: input, shape index: {}]   ;;  %s4089_s5 = inlined_call_operand.vmem [shape: bf16[2,32,32], index: 5, kind: input, shape index: {}]   ;;  %s4090_s6 = inlined_call_operand.vmem [shape: f32[2,1,32], index: 6, kind: input, shape index: {}]   ;;  %s4091_s7 = inlined_call_operand.vmem [shape: f32[2,1,32], index: 7, kind: input, shape index: {}]   ;;  %s4092_s8 = inlined_call_operand.vmem [shape: f32[2,1,32], index: 8, kind: input, shape index: {}]   ;;  %s4093_s9 = inlined_call_operand.vmem [shape: bf16[2,32,64], index: 9, kind: input, shape index: {}]   ;;  %s4094_s10 = inlined_call_operand.vmem [shape: f32[2,1,64], index: 10, kind: input, shape index: {}]   ;;  %s4095_s11 = inlined_call_operand.vmem [shape: bf16[2,64,32], index: 11, kind: input, shape index: {}]   ;;  %s4096_s12 = inlined_call_operand.vmem [shape: f32[2,1,32], index: 12, kind: input, shape index: {}]   ;;  %s4097_s13 = inlined_call_operand.vmem [shape: f32[2,1,32], index: 13, kind: input, shape index: {}]   ;;  %s4098_s14 = inlined_call_operand.vmem [shape: f32[2,1,32], index: 14, kind: input, shape index: {}]   ;;  %s4099_s15 = inlined_call_operand.hbm [shape: f32[16,32], index: 15, kind: output, shape index: {}]  }
   0x1   :  { %v3388_v0 = vld [vmem:[%s4087_s3] sm:$0xff]   ;;  %2996 = vmatprep.subr.bf16.mxu0 %v3510_v1  ;;  %v3389_v2 = vld [vmem:[%s4087_s3 + $0x8] sm:$0xff]   ;;  %3000 = vmatprep.mubr.msk.bf16.mxu0 %vm3511_vm0, %v3510_v1 }
   0x2   :  { %2997 = vmatpush3.bf16.msra.mxu0 %v3388_v0  ;;  %v52_v3 = vld [vmem:[%s4084_s0] sm:$0xff]  ;;  %v53_v4 = vld [vmem:[%s4084_s0 + $0x8] sm:$0xff] }
   0x3   :  { %v56_v5 = vld [vmem:[%s4085_s1] sm:$0xff]  ;;  %2998 = vmatprep.subr.bf16.mxu0 %v3510_v1  ;;  %v54_v6 = vmul.f32 5.656854, %v52_v3  ;;  %v55_v7 = vmul.f32 5.656854, %v53_v4  ;;  %v57_v8 = vld [vmem:[%s4085_s1 + $0x8] sm:$0xff] }
   0x5   :  { %v3628_v9 = vadd.f32 %v56_v5, %v54_v6  ;;  %v3630_v10 = vadd.f32 %v57_v8, %v55_v7 }
   0x6   :  { %2999 = vmatpush3.bf16.msra.mxu0 %v3389_v2 }
   0x7   :  { %v62_v11 = vpack.c.bf16 %v3630_v10, %v3628_v9 }
   0x9   :  { %3001 = vmatmul.mubr.msk.bf16.vlgmr.msra.gmra.mrb[0].mxu0 %vm86_vm1, %v62_v11 }
   0xa   :  { %20 = vsyncpa [#allocation3], 0  ;;  %v2772_v12 = vld [vmem:[%s4088_s4] ss:$0 sm:$0xff]  ;;  %vm141_vm2 = vcmask 64512   ;;  %s3512_s1 = smov 120  }
   0xb   :  { %s3513_s16 = smov 96   ;;  %s3514_s17 = smov 88   ;;  %vm3659_vm3 = vmpackc.low %vm141_vm2, %vm141_vm2  ;;  %v3680_v32 = vld [vmem:[%s4086_s2 + $0x8] sm:$0xff]  ;;  %v3685_v35 = vld [vmem:[%s4086_s2] sm:$0xff]  ;;  %vm229_vm4 = vcmask 130048   ;;  %vm548_vm5 = vcmask 1043456  }
   0xc   :  { %s3515_s22 = smov 64   ;;  %s3516_s23 = smov 80   ;;  %v132_v6 = vld [vmem:[%s4089_s5 + $0x4] sm:$0xf]  ;;  %vm1314_vm6 = vcmask 523264  }
   0xd   :  { %s3517_s26 = smov 112   ;;  %v550_v7 = vsel %vm548_vm5, %v132_v6, 0  ;;  %s3518_s27 = smov 56  }
   0xe   :  { %s4101_s0 = smov 72   ;;  %s3520_s30 = smov 104  }
   0xf   :  { %s3521_s18 = smov 48   ;;  %s4100_s21 = smov 40  }
  0x10   :  { %s4105_s25 = smov 40   ;;  %s3523_s28 = smov [#allocation2]  }
  0x11   :  { %s2761_s29 = sshll.u32 %s3523_s28, 4  ;;  %s2762_s29 = int_to_ptr.vmem [resolvable:$true] %s2761_s29 }
  0x12   :  { %s3486_s19 = scalar_lea.vmem %s2762_s29, 256  ;;  %p3491_p1 = scmp.lt.s32.totalorder %s2762_s29, %s2762_s29 }
  0x13   :  { %p3487_p0 = scmp.ne.s32.totalorder %s2762_s29, %s3486_s19  ;;  %p3492_p2 = scmp.lt.s32.totalorder %s3486_s19, %s3486_s19 }
  0x15   :  { %p3493_p3 = por %p3492_p2, %p3491_p1 }
  0x17   :  { %p3494_p4 = pnand %p3493_p3, %p3487_p0 }
  0xdc   :  { %v124_v13 = vpop.f32.mrb[0].mxu0 }
  0xdd   :  { %v3638_v14 = vadd.f32 %v2772_v12, %v124_v13  ;;  %v3002_v15 = vpop.f32.mrb[1].mxu0 }
  0xde   :  { %v127_v16 = vpop.f32.mrb[2].mxu0 }
  0xdf   :  { %v3640_v17 = vadd.f32 %v2772_v12, %v127_v16  ;;  %340 = vrot.lane.b32.xlu1 %v3638_v14, %s3512_s1  ;;  %v3003_v18 = vpop.f32.mrb[3].mxu0  ;;  %3008 = vmatprep.mubr.msk.f32.mxu1 %vm141_vm2, %v3638_v14 }
  0xe1   :  { %v3648_v19 = vpack.i.bf16 %v3640_v17, %v3638_v14 }
  0xe3   :  { %342 = vrot.lane.b32.xlu1 %v3640_v17, %s3512_s1  ;;  %3309 = vrot.lane.b32.xlu0 %v3648_v19, %s3513_s16 }
  0xe7   :  { %3314 = vrot.lane.b32.xlu0 %v3648_v19, %s3514_s17 }
 0x151   :  { %v341_v20 = vpop.permute.xlu1 %340 }
 0x152   :  { %3022 = vmatprep.mubr.msk.f32.mxu0 %vm141_vm2, %v341_v20 }
 0x155   :  { %v3310_v21 = vpop.permute.xlu0 %3309  ;;  %v343_v30 = vpop.permute.xlu1 %342 }
 0x156   :  { %v3312_v22 = vunpack.i.h.bf16 %v3310_v21  ;;  %v3311_v23 = vunpack.i.l.bf16 %v3310_v21 }
 0x158   :  { %v3212_v25 = vpack.c.bf16 %v3312_v22, %v3311_v23 }
 0x159   :  { %v3315_v26 = vpop.permute.xlu0 %3314 }
 0x15a   :  { %v3317_v27 = vunpack.i.h.bf16 %v3315_v26  ;;  %v3316_v28 = vunpack.i.l.bf16 %v3315_v26  ;;  %3214 = vmatprep.subr.msk.bf16.mxu1 %vm3659_vm3, %v3212_v25 }
 0x15b   :  { %3217 = vmatpush3.bf16.xpose.msk.msra.mxu1 %vm3659_vm3, %v3212_v25 }
 0x15c   :  { %v3222_v29 = vpack.c.bf16 %v3317_v27, %v3316_v28 }
 0x15e   :  { %3224 = vmatprep.subr.msk.bf16.mxu0 %vm3659_vm3, %v3222_v29 }
 0x15f   :  { %3227 = vmatpush3.bf16.xpose.msk.msra.mxu0 %vm3659_vm3, %v3222_v29 }
 0x160   :  { %3032 = vmatprep.subr.bf16.mxu0 %v3510_v1 }
 0x162   :  { %3009 = vmatmul.mubr.msk.f32.vlgmr.msra.gmra.mrb[0].mxu1 %vm141_vm2, %v3640_v17 }
 0x166   :  { %3023 = vmatmul.mubr.msk.f32.vlgmr.msra.gmra.mrb[4].mxu0 %vm141_vm2, %v343_v30 }
 0x167   :  { %3034 = vmatprep.mubr.msk.bf16.mxu0 %vm3511_vm0, %v3510_v1  ;;  %3033 = vmatpush3.bf16.msra.mxu0 %v550_v7 }
 0x235   :  { %v3010_v31 = vpop.f32.mrb[0].mxu1 }
 0x236   :  { %v226_v33 = vmul.f32 0.35355338, %v3010_v31  ;;  %v216_v34 = vpop.f32.mrb[1].mxu1 }
 0x237   :  { %v225_v36 = vmul.f32 0.35355338, %v216_v34 }
 0x238   :  { %v228_v37 = vadd.f32 %v226_v33, %v3680_v32 }
 0x239   :  { %v3024_v38 = vpop.f32.mrb[4].mxu0  ;;  %v227_v39 = vadd.f32 %v225_v36, %v3685_v35 }
 0x23a   :  { %v422_v40 = vpop.f32.mrb[5].mxu0  ;;  %v233_v41 = vsel %vm229_vm4, %v228_v37, -inf  ;;  %v432_v42 = vmul.f32 0.35355338, %v3024_v38 }
 0x23b   :  { %v431_v43 = vmul.f32 0.35355338, %v422_v40  ;;  %234 = vmax.xlane.f32.xlu1 %v233_v41  ;;  %v230_v44 = vsel %vm229_vm4, %v227_v39, -inf  ;;  %v131_v40 = vld [vmem:[%s4089_s5] sm:$0xf] }
 0x23c   :  { %231 = vmax.xlane.f32.xlu0 %v230_v44  ;;  %v434_v47 = vadd.f32 %v432_v42, %v3680_v32  ;;  %v597_v41 = vsel %vm548_vm5, %v131_v40, 0 }
 0x23d   :  { %v433_v45 = vadd.f32 %v431_v43, %v3685_v35 }
 0x23e   :  { %v438_v48 = vsel %vm229_vm4, %v434_v47, -inf }
 0x23f   :  { %v435_v46 = vsel %vm229_vm4, %v433_v45, -inf }
 0x240   :  { %436 = vmax.xlane.f32.xlu0 %v435_v46 }
 0x244   :  { %439 = vmax.xlane.f32.xlu0 %v438_v48 }
 0x2c8   :  { %v235_v49 = vpop.xlane.xlu1 %234 }
 0x2c9   :  { %v237_v50 = vsub.f32 %v228_v37, %v235_v49  ;;  %v232_v51 = vpop.xlane.xlu0 %231 }
 0x2ca   :  { %v236_v52 = vsub.f32 %v227_v39, %v232_v51 }
 0x2cb   :  { %v240_v53 = vmul.f32 1.442695, %v237_v50 }
 0x2cc   :  { %v238_v54 = vmul.f32 1.442695, %v236_v52 }
 0x2cd   :  { %3404 = vpow2.f32 %v240_v53  ;;  %v437_v55 = vpop.xlane.xlu0 %436 }
 0x2ce   :  { %3406 = vpow2.f32 %v238_v54  ;;  %v441_v56 = vsub.f32 %v433_v45, %v437_v55 }
 0x2d0   :  { %v443_v57 = vmul.f32 1.442695, %v441_v56 }
 0x2d1   :  { %v440_v58 = vpop.xlane.xlu0 %439 }
 0x2d2   :  { %3408 = vpow2.f32 %v443_v57  ;;  %v442_v59 = vsub.f32 %v434_v47, %v440_v58 }
 0x2d4   :  { %v445_v60 = vmul.f32 1.442695, %v442_v59 }
 0x2d6   :  { %3410 = vpow2.f32 %v445_v60 }
 0x2d7   :  { %v3405_v61 = vpop.eup %3404 }
 0x2d8   :  { %v3407_v62 = vpop.eup %3406  ;;  %v245_v63 = vsel %vm229_vm4, %v3405_v61, 0.0 }
 0x2d9   :  { %246 = vadd.xlane.f32.xlu0 %v245_v63  ;;  %v242_v0 = vsel %vm229_vm4, %v3407_v62, 0.0 }
 0x2da   :  { %243 = vadd.xlane.f32.xlu1 %v242_v0 }
 0x2dc   :  { %v3409_v2 = vpop.eup %3408 }
 0x2dd   :  { %v447_v3 = vsel %vm229_vm4, %v3409_v2, 0.0 }
 0x2de   :  { %448 = vadd.xlane.f32.xlu1 %v447_v3 }
 0x2e0   :  { %v3411_v4 = vpop.eup %3410 }
 0x2e1   :  { %v450_v5 = vsel %vm229_vm4, %v3411_v4, 0.0 }
 0x2e2   :  { %451 = vadd.xlane.f32.xlu0 %v450_v5 }
 0x2ef   :  { %3319 = vrot.lane.b32.xlu1 %v3648_v19, %s3515_s22 }
 0x2f3   :  { %3329 = vrot.lane.b32.xlu1 %v3648_v19, %s3516_s23 }
 0x2f7   :  { %640 = vrot.lane.b32.xlu1 %v3638_v14, %s3517_s26 }
 0x2f8   :  { %3324 = vrot.lane.b32.xlu0 %v3648_v19, %s3518_s27 }
 0x2fc   :  { %642 = vrot.lane.b32.xlu0 %v3640_v17, %s3517_s26 }
 0x366   :  { %v247_v8 = vpop.xlane.xlu0 %246 }
 0x367   :  { %v244_v11 = vpop.xlane.xlu1 %243 }
 0x368   :  { %3412 = vrcp.f32 %v244_v11 }
 0x369   :  { %3414 = vrcp.f32 %v247_v8 }
 0x36b   :  { %v449_v12 = vpop.xlane.xlu1 %448 }
 0x36c   :  { %3416 = vrcp.f32 %v449_v12 }
 0x36f   :  { %v3320_v13 = vpop.permute.xlu1 %3319  ;;  %v452_v15 = vpop.xlane.xlu0 %451 }
 0x370   :  { %v3322_v16 = vunpack.i.h.bf16 %v3320_v13  ;;  %v3321_v18 = vunpack.i.l.bf16 %v3320_v13  ;;  %3418 = vrcp.f32 %v452_v15 }
 0x372   :  { %v3413_v20 = vpop.eup %3412  ;;  %v3218_v21 = vpack.c.bf16 %v3322_v16, %v3321_v18 }
 0x373   :  { %v3415_v22 = vpop.eup %3414  ;;  %v3330_v23 = vpop.permute.xlu1 %3329  ;;  %v250_v26 = vmul.f32 %v3413_v20, %v3407_v62 }
 0x374   :  { %v3325_v25 = vpop.permute.xlu0 %3324  ;;  %v3332_v27 = vunpack.i.h.bf16 %v3330_v23  ;;  %v3331_v28 = vunpack.i.l.bf16 %v3330_v23  ;;  %3219 = vmatprep.subr.bf16.mxu1 %v3218_v21  ;;  %v251_v33 = vmul.f32 %v3415_v22, %v3405_v61 }
 0x375   :  { %v3327_v29 = vunpack.i.h.bf16 %v3325_v25  ;;  %v3326_v30 = vunpack.i.l.bf16 %v3325_v25  ;;  %3221 = vmatpush3.bf16.msra.mxu1 %v3218_v21  ;;  %3015 = vmatprep.mubr.msk.f32.mxu1 %vm229_vm4, %v250_v26 }
 0x376   :  { %v3417_v31 = vpop.eup %3416  ;;  %v3232_v34 = vpack.c.bf16 %v3332_v27, %v3331_v28 }
 0x377   :  { %v3228_v36 = vpack.c.bf16 %v3327_v29, %v3326_v30  ;;  %v455_v37 = vmul.f32 %v3417_v31, %v3409_v2  ;;  %v641_v48 = vpop.permute.xlu1 %640 }
 0x378   :  { %3016 = vmatmul.mubr.msk.f32.vlgmr.msra.gmra.mrb[2].mxu1 %vm229_vm4, %v251_v33  ;;  %3234 = vmatprep.subr.msk.bf16.mxu0 %vm3659_vm3, %v3232_v34  ;;  %v643_v49 = vpop.permute.xlu0 %642 }
 0x379   :  { %3229 = vmatprep.subr.bf16.mxu1 %v3228_v36  ;;  %3029 = vmatprep.mubr.msk.f32.mxu1 %vm229_vm4, %v455_v37 }
 0x37a   :  { %3231 = vmatpush3.bf16.msra.mxu1 %v3228_v36  ;;  %v3419_v38 = vpop.eup %3418 }
 0x37b   :  { %3038 = vmatprep.subr.bf16.mxu1 %v3510_v1  ;;  %v456_v39 = vmul.f32 %v3419_v38, %v3411_v4 }
 0x37d   :  { %3030 = vmatmul.mubr.msk.f32.vlgmr.msra.gmra.mrb[4].mxu1 %vm229_vm4, %v456_v39 }
 0x37e   :  { %3040 = vmatprep.mubr.msk.bf16.mxu1 %vm3511_vm0, %v3510_v1  ;;  %3039 = vmatpush3.bf16.msra.mxu1 %v597_v41 }
 0x44b   :  { %v3017_v42 = vpop.f32.mrb[2].mxu1 }
 0x44c   :  { %v330_v43 = vpop.f32.mrb[3].mxu1 }
 0x44d   :  { %v339_v44 = vpack.c.bf16 %v3017_v42, %v330_v43 }
 0x44f   :  { %3041 = vmatmul.mubr.msk.bf16.vlgmr.msra.gmra.mrb[8].mxu1 %vm141_vm2, %v339_v44 }
 0x450   :  { %v3031_v45 = vpop.f32.mrb[4].mxu1 }
 0x451   :  { %v535_v46 = vpop.f32.mrb[5].mxu1 }
 0x452   :  { %v544_v47 = vpack.c.bf16 %v3031_v45, %v535_v46 }
 0x454   :  { %3035 = vmatmul.mubr.msk.bf16.vlgmr.msra.gmra.mrb[8].mxu0 %vm141_vm2, %v544_v47 }
 0x455   :  { %3237 = vmatpush3.bf16.xpose.msk.msra.mxu0 %vm3659_vm3, %v3232_v34  ;;  %3048 = vmatprep.mubr.msk.f32.mxu0 %vm141_vm2, %v641_v48 }
 0x45c   :  { %3049 = vmatmul.mubr.msk.f32.vlgmr.msra.gmra.mrb[6].mxu0 %vm141_vm2, %v643_v49 }
 0x522   :  { %v633_v50 = vpop.f32.mrb[8].mxu1 }
 0x523   :  { %v3042_v51 = vpop.f32.mrb[9].mxu1 }
 0x524   :  { %v636_v52 = vpop.f32.mrb[10].mxu1 }
 0x525   :  { %v3043_v53 = vpop.f32.mrb[11].mxu1 }
 0x527   :  { %v586_v54 = vpop.f32.mrb[8].mxu0 }
 0x528   :  { %v3732_v55 = vadd.f32 %v633_v50, %v586_v54  ;;  %v3036_v56 = vpop.f32.mrb[9].mxu0 }
 0x529   :  { %v589_v57 = vpop.f32.mrb[10].mxu0 }
 0x52a   :  { %v3734_v58 = vadd.f32 %v636_v52, %v589_v57  ;;  %v3037_v59 = vpop.f32.mrb[11].mxu0 }
 0x52f   :  { %v3050_v60 = vpop.f32.mrb[6].mxu0 }
 0x530   :  { %v732_v61 = vmul.f32 0.35355338, %v3050_v60  ;;  %v722_v62 = vpop.f32.mrb[7].mxu0 }
 0x531   :  { %v731_v63 = vmul.f32 0.35355338, %v722_v62 }
 0x532   :  { %v734_v0 = vadd.f32 %v732_v61, %v3680_v32 }
 0x533   :  { %v733_v2 = vadd.f32 %v731_v63, %v3685_v35 }
 0x534   :  { %v738_v3 = vsel %vm229_vm4, %v734_v0, -inf }
 0x535   :  { %739 = vmax.xlane.f32.xlu0 %v738_v3  ;;  %v735_v4 = vsel %vm229_vm4, %v733_v2, -inf }
 0x536   :  { %736 = vmax.xlane.f32.xlu1 %v735_v4 }
 0x5c2   :  { %v740_v5 = vpop.xlane.xlu0 %739 }
 0x5c3   :  { %v742_v6 = vsub.f32 %v734_v0, %v740_v5  ;;  %v737_v7 = vpop.xlane.xlu1 %736 }
 0x5c4   :  { %v741_v8 = vsub.f32 %v733_v2, %v737_v7 }
 0x5c5   :  { %v745_v11 = vmul.f32 1.442695, %v742_v6 }
 0x5c6   :  { %v743_v12 = vmul.f32 1.442695, %v741_v8 }
 0x5c7   :  { %3420 = vpow2.f32 %v745_v11 }
 0x5c8   :  { %3422 = vpow2.f32 %v743_v12 }
 0x5d1   :  { %v3421_v13 = vpop.eup %3420 }
 0x5d2   :  { %v3423_v15 = vpop.eup %3422  ;;  %v750_v16 = vsel %vm229_vm4, %v3421_v13, 0.0 }
 0x5d3   :  { %751 = vadd.xlane.f32.xlu1 %v750_v16  ;;  %v747_v18 = vsel %vm229_vm4, %v3423_v15, 0.0 }
 0x5d4   :  { %748 = vadd.xlane.f32.xlu0 %v747_v18 }
 0x5e4   :  { %3339 = vrot.lane.b32.xlu1 %v3648_v19, %s4101_s0 }
 0x5e8   :  { %894 = vrot.lane.b32.xlu1 %v3638_v14, %s3520_s30  ;;  %v133_v14 = vld [vmem:[%s4089_s5 + $0x8] sm:$0xf] }
 0x5e9   :  { %v849_v34 = vsel %vm548_vm5, %v133_v14, 0 }
 0x5ea   :  { %3334 = vrot.lane.b32.xlu0 %v3648_v19, %s3521_s18 }
 0x5ee   :  { %896 = vrot.lane.b32.xlu0 %v3640_v17, %s3520_s30 }
 0x660   :  { %v752_v20 = vpop.xlane.xlu1 %751 }
 0x661   :  { %3424 = vrcp.f32 %v752_v20  ;;  %v749_v21 = vpop.xlane.xlu0 %748 }
 0x662   :  { %3426 = vrcp.f32 %v749_v21 }
 0x664   :  { %v3340_v27 = vpop.permute.xlu1 %3339 }
 0x665   :  { %v3335_v22 = vpop.permute.xlu0 %3334  ;;  %v3342_v30 = vunpack.i.h.bf16 %v3340_v27  ;;  %v3341_v31 = vunpack.i.l.bf16 %v3340_v27 }
 0x666   :  { %v3337_v23 = vunpack.i.h.bf16 %v3335_v22  ;;  %v3336_v25 = vunpack.i.l.bf16 %v3335_v22 }
 0x667   :  { %v3242_v36 = vpack.c.bf16 %v3342_v30, %v3341_v31 }
 0x668   :  { %v3238_v26 = vpack.c.bf16 %v3337_v23, %v3336_v25  ;;  %v895_v40 = vpop.permute.xlu1 %894  ;;  %v2804_v23 = vld [vmem:[%s4090_s6] ss:$0 sm:$0xff] }
 0x669   :  { %v897_v41 = vpop.permute.xlu0 %896 }
 0x66a   :  { %3239 = vmatprep.subr.bf16.mxu1 %v3238_v26 }
 0x66b   :  { %v3425_v28 = vpop.eup %3424  ;;  %3241 = vmatpush3.bf16.msra.mxu1 %v3238_v26 }
 0x66c   :  { %v3427_v29 = vpop.eup %3426  ;;  %3058 = vmatprep.subr.bf16.mxu1 %v3510_v1  ;;  %v756_v33 = vmul.f32 %v3425_v28, %v3421_v13 }
 0x66d   :  { %v755_v17 = vmul.f32 %v3427_v29, %v3423_v15 }
 0x66f   :  { %3055 = vmatprep.mubr.msk.f32.mxu1 %vm229_vm4, %v755_v17 }
 0x670   :  { %3056 = vmatmul.mubr.msk.f32.vlgmr.msra.gmra.mrb[6].mxu1 %vm229_vm4, %v756_v33 }
 0x671   :  { %3059 = vmatpush3.bf16.msra.mxu1 %v849_v34  ;;  %3060 = vmatprep.mubr.msk.bf16.mxu1 %vm3511_vm0, %v3510_v1 }
 0x672   :  { %3244 = vmatprep.subr.msk.bf16.mxu1 %vm3659_vm3, %v3242_v36 }
 0x743   :  { %v3057_v37 = vpop.f32.mrb[6].mxu1 }
 0x744   :  { %v835_v38 = vpop.f32.mrb[7].mxu1 }
 0x745   :  { %v844_v39 = vpack.c.bf16 %v3057_v37, %v835_v38 }
 0x747   :  { %3061 = vmatmul.mubr.msk.bf16.vlgmr.msra.gmra.mrb[12].mxu1 %vm141_vm2, %v844_v39 }
 0x748   :  { %3247 = vmatpush3.bf16.xpose.msk.msra.mxu1 %vm3659_vm3, %v3242_v36  ;;  %3068 = vmatprep.mubr.msk.f32.mxu1 %vm141_vm2, %v895_v40 }
 0x749   :  { %3078 = vmatprep.subr.bf16.mxu1 %v3510_v1 }
 0x74f   :  { %3069 = vmatmul.mubr.msk.f32.vlgmr.msra.gmra.mrb[16].mxu1 %vm141_vm2, %v897_v41 }
 0x750   :  { %3080 = vmatprep.mubr.msk.bf16.mxu1 %vm3511_vm0, %v3510_v1 }
 0x81a   :  { %v885_v42 = vpop.f32.mrb[12].mxu1 }
 0x81b   :  { %v892_v43 = vadd.f32 %v885_v42, %v3732_v55  ;;  %v3062_v44 = vpop.f32.mrb[13].mxu1 }
 0x81c   :  { %v888_v45 = vpop.f32.mrb[14].mxu1 }
 0x81d   :  { %v893_v46 = vadd.f32 %v888_v45, %v3734_v58  ;;  %v3063_v47 = vpop.f32.mrb[15].mxu1  ;;  %v3391_v45 = vld [vmem:[%s4093_s9 + $0x8] sm:$0xff]  }
 0x81e   :  { %v3393_v47 = vld [vmem:[%s4095_s11 + $0x8] sm:$0xff]  }
 0x822   :  { %v3070_v48 = vpop.f32.mrb[16].mxu1 }
 0x823   :  { %v986_v49 = vmul.f32 0.35355338, %v3070_v48  ;;  %v976_v50 = vpop.f32.mrb[17].mxu1 }
 0x824   :  { %v985_v51 = vmul.f32 0.35355338, %v976_v50 }
 0x825   :  { %v988_v52 = vadd.f32 %v986_v49, %v3680_v32 }
 0x826   :  { %v987_v53 = vadd.f32 %v985_v51, %v3685_v35 }
 0x827   :  { %v992_v54 = vsel %vm229_vm4, %v988_v52, -inf }
 0x828   :  { %993 = vmax.xlane.f32.xlu0 %v992_v54  ;;  %v989_v56 = vsel %vm229_vm4, %v987_v53, -inf }
 0x829   :  { %990 = vmax.xlane.f32.xlu1 %v989_v56 }
 0x8b5   :  { %v994_v55 = vpop.xlane.xlu0 %993 }
 0x8b6   :  { %v996_v57 = vsub.f32 %v988_v52, %v994_v55  ;;  %v991_v59 = vpop.xlane.xlu1 %990  ;;  %v2805_v55 = vld [vmem:[%s4091_s7] ss:$0 sm:$0xff] }
 0x8b7   :  { %v995_v60 = vsub.f32 %v987_v53, %v991_v59 }
 0x8b8   :  { %v999_v58 = vmul.f32 1.442695, %v996_v57 }
 0x8b9   :  { %v997_v61 = vmul.f32 1.442695, %v995_v60 }
 0x8ba   :  { %3428 = vpow2.f32 %v999_v58  ;;  %v2806_v58 = vld [vmem:[%s4092_s8] ss:$0 sm:$0xff] }
 0x8bb   :  { %3430 = vpow2.f32 %v997_v61 }
 0x8c4   :  { %v3429_v62 = vpop.eup %3428 }
 0x8c5   :  { %v3431_v63 = vpop.eup %3430  ;;  %v1004_v0 = vsel %vm229_vm4, %v3429_v62, 0.0 }
 0x8c6   :  { %1005 = vadd.xlane.f32.xlu1 %v1004_v0  ;;  %v1001_v2 = vsel %vm229_vm4, %v3431_v63, 0.0 }
 0x8c7   :  { %1002 = vadd.xlane.f32.xlu0 %v1001_v2  ;;  %v3394_v2 = vld [vmem:[%s4095_s11 + $0x10] sm:$0xff]  }
 0x8dd   :  { %3344 = vrot.lane.b32.xlu0 %v3648_v19, %s4100_s21  ;;  %v134_v19 = vld [vmem:[%s4089_s5 + $0xc] sm:$0xf] }
 0x8de   :  { %v1103_v16 = vsel %vm548_vm5, %v134_v19, 0 }
 0x8df   :  { %3079 = vmatpush3.bf16.msra.mxu1 %v1103_v16  ;;  %v2811_v16 = vld [vmem:[%s4096_s12] ss:$0 sm:$0xff] }
 0x8e0   :  { %3092 = vmatprep.subr.bf16.mxu1 %v3510_v1 }
 0x953   :  { %v1006_v3 = vpop.xlane.xlu1 %1005 }
 0x954   :  { %3432 = vrcp.f32 %v1006_v3  ;;  %v1003_v4 = vpop.xlane.xlu0 %1002  ;;  %v3395_v3 = vld [vmem:[%s4095_s11 + $0x18] sm:$0xff]  }
 0x955   :  { %3434 = vrcp.f32 %v1003_v4  ;;  %v2807_v4 = vld [vmem:[%s4094_s10] ss:$0 sm:$0xff] }
 0x958   :  { %v3345_v5 = vpop.permute.xlu0 %3344 }
 0x959   :  { %v3347_v6 = vunpack.i.h.bf16 %v3345_v5  ;;  %v3346_v7 = vunpack.i.l.bf16 %v3345_v5 }
 0x95b   :  { %v3248_v8 = vpack.c.bf16 %v3347_v6, %v3346_v7 }
 0x95d   :  { %3249 = vmatprep.subr.bf16.mxu0 %v3248_v8 }
 0x95e   :  { %v3433_v11 = vpop.eup %3432  ;;  %3251 = vmatpush3.bf16.msra.mxu0 %v3248_v8 }
 0x95f   :  { %v3435_v12 = vpop.eup %3434  ;;  %3084 = vmatprep.subr.bf16.mxu0 %v3510_v1  ;;  %v1010_v15 = vmul.f32 %v3433_v11, %v3429_v62 }
 0x960   :  { %v1009_v13 = vmul.f32 %v3435_v12, %v3431_v63 }
 0x962   :  { %3075 = vmatprep.mubr.msk.f32.mxu0 %vm229_vm4, %v1009_v13 }
 0x963   :  { %3076 = vmatmul.mubr.msk.f32.vlgmr.msra.gmra.mrb[12].mxu0 %vm229_vm4, %v1010_v15 }
 0x964   :  { %3088 = vmatprep.mubr.msk.bf16.mxu0 %vm3511_vm0, %v3510_v1 }
 0xa36   :  { %v3077_v18 = vpop.f32.mrb[12].mxu0 }
 0xa37   :  { %v1089_v20 = vpop.f32.mrb[13].mxu0 }
 0xa38   :  { %v1098_v21 = vpack.c.bf16 %v3077_v18, %v1089_v20 }
 0xa3a   :  { %3081 = vmatmul.mubr.msk.bf16.vlgmr.msra.gmra.mrb[20].mxu1 %vm141_vm2, %v1098_v21 }
 0xa3b   :  { %3100 = vmatprep.mubr.msk.bf16.mxu1 %vm3511_vm0, %v3510_v1 }
 0xb0d   :  { %v1139_v22 = vpop.f32.mrb[20].mxu1 }
 0xb0e   :  { %v1146_v25 = vadd.f32 %v1139_v22, %v892_v43  ;;  %v3082_v26 = vpop.f32.mrb[21].mxu1 }
 0xb0f   :  { %v1142_v27 = vpop.f32.mrb[22].mxu1 }
 0xb10   :  { %v1155_v28 = vadd.f32 %v2804_v23, %v1146_v25  ;;  %v1147_v14 = vadd.f32 %v1142_v27, %v893_v46  ;;  %v3083_v29 = vpop.f32.mrb[23].mxu1  ;;  %v3392_v46 = vld [vmem:[%s4095_s11] sm:$0xff]  }
 0xb11   :  { %3093 = vmatpush3.bf16.msra.mxu1 %v3392_v46 }
 0xb12   :  { %v1156_v30 = vadd.f32 %v2804_v23, %v1147_v14  ;;  %v1157_v31 = vadd.f32 %v1155_v28, %v3628_v9  ;;  %3094 = vmatprep.subr.bf16.mxu1 %v3510_v1 }
 0xb14   :  { %v1161_v17 = vsel %vm86_vm1, %v1157_v31, 0.0  ;;  %v1158_v33 = vadd.f32 %v1156_v30, %v3630_v10  ;;  %v3390_v10 = vld [vmem:[%s4093_s9] sm:$0xff]  }
 0xb15   :  { %1162 = vadd.xlane.f32.xlu1 %v1161_v17  ;;  %3085 = vmatpush3.bf16.msra.mxu0 %v3390_v10 }
 0xb16   :  { %v1164_v34 = vsel %vm86_vm1, %v1158_v33, 0.0  ;;  %3086 = vmatprep.subr.bf16.mxu0 %v3510_v1  ;;  %3095 = vmatpush3.bf16.msra.mxu1 %v3393_v47 }
 0xb17   :  { %3096 = vmatprep.subr.bf16.mxu1 %v3510_v1 }
 0xb19   :  { %1165 = vadd.xlane.f32.xlu1 %v1164_v34  ;;  %3087 = vmatpush3.bf16.msra.mxu0 %v3391_v45 }
 0xb1a   :  { %3104 = vmatprep.subr.bf16.mxu0 %v3510_v1  ;;  %3097 = vmatpush3.bf16.msra.mxu1 %v3394_v2 }
 0xb1b   :  { %3098 = vmatprep.subr.bf16.mxu1 %v3510_v1 }
 0xb1e   :  { %3099 = vmatpush3.bf16.msra.mxu1 %v3395_v3 }
 0xba2   :  { %v1163_v36 = vpop.xlane.xlu1 %1162 }
 0xba3   :  { %v1168_v37 = vmul.f32 0.03125, %v1163_v36 }
 0xba5   :  { %v1170_v38 = vsub.f32 %v1157_v31, %v1168_v37 }
 0xba6   :  { %v1166_v39 = vpop.xlane.xlu1 %1165 }
 0xba7   :  { %v1169_v40 = vmul.f32 0.03125, %v1166_v39  ;;  %v1172_v41 = vmul.f32 %v1170_v38, %v1170_v38 }
 0xba9   :  { %v1171_v42 = vsub.f32 %v1158_v33, %v1169_v40  ;;  %v1174_v43 = vsel %vm86_vm1, %v1172_v41, 0.0  ;;  %v3396_v40 = vld [vmem:[%s4087_s3 + $0x10] sm:$0xff]   ;;  %v3397_v41 = vld [vmem:[%s4087_s3 + $0x18] sm:$0xff]  }
 0xbaa   :  { %1175 = vadd.xlane.f32.xlu1 %v1174_v43 }
 0xbab   :  { %v1173_v44 = vmul.f32 %v1171_v42, %v1171_v42 }
 0xbad   :  { %v1177_v9 = vsel %vm86_vm1, %v1173_v44, 0.0 }
 0xbae   :  { %1178 = vadd.xlane.f32.xlu1 %v1177_v9 }
 0xc37   :  { %v1176_v48 = vpop.xlane.xlu1 %1175 }
 0xc38   :  { %v1180_v49 = vmul.f32 0.03125, %v1176_v48  ;;  %v2817_v48 = vld [vmem:[%s4097_s13] ss:$0 sm:$0xff] }
 0xc3a   :  { %v1182_v50 = vadd.f32 1e-05, %v1180_v49 }
 0xc3b   :  { %v1179_v51 = vpop.xlane.xlu1 %1178 }
 0xc3c   :  { %3436 = vrsqrt.f32 %v1182_v50  ;;  %v1181_v52 = vmul.f32 0.03125, %v1179_v51 }
 0xc3e   :  { %v1183_v53 = vadd.f32 1e-05, %v1181_v52  ;;  %v2818_v52 = vld [vmem:[%s4098_s14] ss:$0 sm:$0xff] }
 0xc40   :  { %3438 = vrsqrt.f32 %v1183_v53 }
 0xc46   :  { %v3437_v54 = vpop.eup %3436 }
 0xc47   :  { %v1186_v56 = vmul.f32 %v3437_v54, %v1170_v38 }
 0xc49   :  { %v1194_v59 = vmul.f32 %v2805_v55, %v1186_v56 }
 0xc4a   :  { %v3439_v57 = vpop.eup %3438 }
 0xc4b   :  { %v1187_v60 = vmul.f32 %v3439_v57, %v1171_v42  ;;  %v1202_v62 = vadd.f32 %v2806_v58, %v1194_v59  ;;  %v2824_v57 = vld [vmem:[%s4088_s4 + $0x1] ss:$0 sm:$0xff] }
 0xc4d   :  { %v1195_v61 = vmul.f32 %v2805_v55, %v1187_v60 }
 0xc4f   :  { %v1203_v63 = vadd.f32 %v2806_v58, %v1195_v61 }
 0xc51   :  { %v1204_v0 = vpack.c.bf16 %v1203_v63, %v1202_v62 }
 0xc53   :  { %3089 = vmatmul.mubr.msk.bf16.vlgmr.msra.gmra.mrb[16].mxu0 %vm86_vm1, %v1204_v0 }
 0xc54   :  { %3108 = vmatprep.mubr.msk.bf16.mxu0 %vm3511_vm0, %v3510_v1  ;;  %3105 = vmatpush3.bf16.msra.mxu0 %v3396_v40 }
 0xc55   :  { %3106 = vmatprep.subr.bf16.mxu0 %v3510_v1 }
 0xc58   :  { %3107 = vmatpush3.bf16.msra.mxu0 %v3397_v41 }
 0xd26   :  { %v1265_v5 = vpop.f32.mrb[16].mxu0 }
 0xd27   :  { %v1266_v6 = vadd.f32 %v2807_v4, %v1265_v5  ;;  %v3090_v7 = vpop.f32.mrb[17].mxu0 }
 0xd28   :  { %v1268_v8 = vpop.f32.mrb[18].mxu0 }
 0xd29   :  { %v1269_v11 = vadd.f32 %v2807_v4, %v1268_v8  ;;  %v3091_v12 = vpop.f32.mrb[19].mxu0  ;;  %v1272_v13 = vmax.f32 %v1266_v6, 0.0 }
 0xd2b   :  { %v1273_v15 = vmax.f32 %v1269_v11, 0.0 }
 0xd2d   :  { %v1274_v19 = vpack.c.bf16 %v1273_v15, %v1272_v13 }
 0xd2f   :  { %3101 = vmatmul.mubr.msk.bf16.vlgmr.msra.gmra.mrb[24].mxu1 %vm1314_vm6, %v1274_v19 }
 0xe02   :  { %v1352_v18 = vpop.f32.mrb[24].mxu1 }
 0xe03   :  { %v1353_v20 = vadd.f32 %v2811_v16, %v1352_v18  ;;  %v3102_v21 = vpop.f32.mrb[25].mxu1 }
 0xe04   :  { %v1355_v22 = vpop.f32.mrb[26].mxu1 }
 0xe05   :  { %v1356_v23 = vadd.f32 %v2811_v16, %v1355_v22  ;;  %v3103_v25 = vpop.f32.mrb[27].mxu1  ;;  %v1359_v26 = vadd.f32 %v1353_v20, %v1202_v62 }
 0xe07   :  { %v1363_v27 = vsel %vm86_vm1, %v1359_v26, 0.0  ;;  %v1360_v28 = vadd.f32 %v1356_v23, %v1203_v63 }
 0xe08   :  { %1364 = vadd.xlane.f32.xlu1 %v1363_v27 }
 0xe09   :  { %v1366_v14 = vsel %vm86_vm1, %v1360_v28, 0.0 }
 0xe0c   :  { %1367 = vadd.xlane.f32.xlu1 %v1366_v14 }
 0xe95   :  { %v1365_v29 = vpop.xlane.xlu1 %1364 }
 0xe96   :  { %v1369_v30 = vmul.f32 0.03125, %v1365_v29 }
 0xe98   :  { %v1371_v31 = vsub.f32 %v1359_v26, %v1369_v30 }
 0xe99   :  { %v1368_v17 = vpop.xlane.xlu1 %1367 }
 0xe9a   :  { %v1370_v33 = vmul.f32 0.03125, %v1368_v17  ;;  %v1373_v34 = vmul.f32 %v1371_v31, %v1371_v31 }
 0xe9c   :  { %v1372_v36 = vsub.f32 %v1360_v28, %v1370_v33  ;;  %v1375_v37 = vsel %vm86_vm1, %v1373_v34, 0.0 }
 0xe9d   :  { %1376 = vadd.xlane.f32.xlu0 %v1375_v37 }
 0xe9e   :  { %v1374_v38 = vmul.f32 %v1372_v36, %v1372_v36 }
 0xea0   :  { %v1378_v39 = vsel %vm86_vm1, %v1374_v38, 0.0 }
 0xea1   :  { %1379 = vadd.xlane.f32.xlu1 %v1378_v39 }
 0xf2a   :  { %v1377_v42 = vpop.xlane.xlu0 %1376 }
 0xf2b   :  { %v1381_v43 = vmul.f32 0.03125, %v1377_v42 }
 0xf2d   :  { %v1383_v44 = vadd.f32 1e-05, %v1381_v43 }
 0xf2e   :  { %v1380_v9 = vpop.xlane.xlu1 %1379 }
 0xf2f   :  { %3440 = vrsqrt.f32 %v1383_v44  ;;  %v1382_v10 = vmul.f32 0.03125, %v1380_v9 }
 0xf31   :  { %v1384_v45 = vadd.f32 1e-05, %v1382_v10 }
 0xf33   :  { %3442 = vrsqrt.f32 %v1384_v45 }
 0xf39   :  { %v3441_v46 = vpop.eup %3440 }
 0xf3a   :  { %v1387_v47 = vmul.f32 %v3441_v46, %v1371_v31 }
 0xf3c   :  { %v1395_v50 = vmul.f32 %v2817_v48, %v1387_v47 }
 0xf3d   :  { %v3443_v49 = vpop.eup %3442 }
 0xf3e   :  { %v1388_v51 = vmul.f32 %v3443_v49, %v1372_v36  ;;  %v3857_v54 = vadd.f32 %v2818_v52, %v1395_v50 }
 0xf40   :  { %v1396_v53 = vmul.f32 %v2817_v48, %v1388_v51 }
 0xf42   :  { %v3859_v56 = vadd.f32 %v2818_v52, %v1396_v53 }
 0xf44   :  { %v1405_v55 = vpack.c.bf16 %v3859_v56, %v3857_v54 }
 0xf46   :  { %3109 = vmatmul.mubr.msk.bf16.vlgmr.msra.gmra.mrb[20].mxu0 %vm86_vm1, %v1405_v55 }
0x1019   :  { %v1468_v59 = vpop.f32.mrb[20].mxu0 }
0x101a   :  { %v3867_v60 = vadd.f32 %v2824_v57, %v1468_v59  ;;  %v3110_v58 = vpop.f32.mrb[21].mxu0 }
0x101b   :  { %v1471_v61 = vpop.f32.mrb[22].mxu0 }
0x101c   :  { %v3869_v62 = vadd.f32 %v2824_v57, %v1471_v61  ;;  %v3111_v63 = vpop.f32.mrb[23].mxu0  ;;  %3116 = vmatprep.mubr.msk.f32.mxu0 %vm141_vm2, %v3867_v60 }
0x101e   :  { %1685 = vrot.lane.b32.xlu0 %v3869_v62, %s3512_s1  ;;  %v3877_v0 = vpack.i.bf16 %v3869_v62, %v3867_v60 }
0x1020   :  { %3349 = vrot.lane.b32.xlu1 %v3877_v0, %s3513_s16 }
0x1024   :  { %3354 = vrot.lane.b32.xlu1 %v3877_v0, %s3514_s17 }
0x1028   :  { %1683 = vrot.lane.b32.xlu1 %v3867_v60, %s3512_s1 }
0x1090   :  { %v1686_v13 = vpop.permute.xlu0 %1685 }
0x1092   :  { %v3350_v2 = vpop.permute.xlu1 %3349 }
0x1093   :  { %v3352_v3 = vunpack.i.h.bf16 %v3350_v2  ;;  %v3351_v4 = vunpack.i.l.bf16 %v3350_v2 }
0x1095   :  { %v3252_v5 = vpack.c.bf16 %v3352_v3, %v3351_v4 }
0x1096   :  { %v3355_v6 = vpop.permute.xlu1 %3354 }
0x1097   :  { %v3357_v7 = vunpack.i.h.bf16 %v3355_v6  ;;  %v3356_v8 = vunpack.i.l.bf16 %v3355_v6  ;;  %3254 = vmatprep.subr.msk.bf16.mxu0 %vm3659_vm3, %v3252_v5 }
0x1098   :  { %3257 = vmatpush3.bf16.xpose.msk.msra.mxu0 %vm3659_vm3, %v3252_v5 }
0x1099   :  { %v3262_v11 = vpack.c.bf16 %v3357_v7, %v3356_v8 }
0x109a   :  { %v1684_v12 = vpop.permute.xlu1 %1683 }
0x109b   :  { %3264 = vmatprep.subr.msk.bf16.mxu0 %vm3659_vm3, %v3262_v11 }
0x109f   :  { %3117 = vmatmul.mubr.msk.f32.vlgmr.msra.gmra.mrb[14].mxu0 %vm141_vm2, %v3869_v62 }
0x10a0   :  { %3267 = vmatpush3.bf16.xpose.msk.msra.mxu0 %vm3659_vm3, %v3262_v11  ;;  %3130 = vmatprep.mubr.msk.f32.mxu0 %vm141_vm2, %v1684_v12  ;;  %v2829_v12 = vld [vmem:[%s4089_s5 + $0x14] sm:$0xf] }
0x10a1   :  { %3146 = vmatprep.subr.bf16.mxu0 %v3510_v1 }
0x10a7   :  { %3131 = vmatmul.mubr.msk.f32.vlgmr.msra.gmra.mrb[24].mxu0 %vm141_vm2, %v1686_v13 }
0x10a8   :  { %3148 = vmatprep.mubr.msk.bf16.mxu0 %vm3511_vm0, %v3510_v1 }
0x1172   :  { %v3118_v15 = vpop.f32.mrb[14].mxu0 }
0x1173   :  { %v1570_v19 = vmul.f32 0.35355338, %v3118_v15  ;;  %v1560_v16 = vpop.f32.mrb[15].mxu0 }
0x1174   :  { %v1569_v18 = vmul.f32 0.35355338, %v1560_v16 }
0x1175   :  { %v1572_v20 = vadd.f32 %v1570_v19, %v3680_v32 }
0x1176   :  { %v1571_v21 = vadd.f32 %v1569_v18, %v3685_v35  ;;  %v1892_v18 = vsel %vm548_vm5, %v2829_v12, 0 }
0x1177   :  { %v1576_v22 = vsel %vm229_vm4, %v1572_v20, -inf }
0x1178   :  { %1577 = vmax.xlane.f32.xlu0 %v1576_v22  ;;  %v1573_v23 = vsel %vm229_vm4, %v1571_v21, -inf }
0x1179   :  { %1574 = vmax.xlane.f32.xlu1 %v1573_v23 }
0x117a   :  { %v3132_v25 = vpop.f32.mrb[24].mxu0 }
0x117b   :  { %v1765_v26 = vpop.f32.mrb[25].mxu0  ;;  %v1775_v27 = vmul.f32 0.35355338, %v3132_v25 }
0x117c   :  { %v1774_v28 = vmul.f32 0.35355338, %v1765_v26 }
0x117d   :  { %v1777_v30 = vadd.f32 %v1775_v27, %v3680_v32 }
0x117e   :  { %v1776_v14 = vadd.f32 %v1774_v28, %v3685_v35 }
0x117f   :  { %v1781_v31 = vsel %vm229_vm4, %v1777_v30, -inf }
0x1180   :  { %v1778_v29 = vsel %vm229_vm4, %v1776_v14, -inf }
0x1181   :  { %1779 = vmax.xlane.f32.xlu1 %v1778_v29 }
0x1185   :  { %1782 = vmax.xlane.f32.xlu1 %v1781_v31 }
0x1205   :  { %v1578_v17 = vpop.xlane.xlu0 %1577 }
0x1206   :  { %v1580_v33 = vsub.f32 %v1572_v20, %v1578_v17  ;;  %v1575_v34 = vpop.xlane.xlu1 %1574 }
0x1207   :  { %v1579_v36 = vsub.f32 %v1571_v21, %v1575_v34  ;;  %v2828_v21 = vld [vmem:[%s4089_s5 + $0x10] sm:$0xf] }
0x1208   :  { %v1583_v37 = vmul.f32 1.442695, %v1580_v33  ;;  %v1939_v22 = vsel %vm548_vm5, %v2828_v21, 0 }
0x1209   :  { %v1581_v38 = vmul.f32 1.442695, %v1579_v36  ;;  %3147 = vmatpush3.bf16.msra.mxu0 %v1939_v22 }
0x120a   :  { %3444 = vpow2.f32 %v1583_v37 }
0x120b   :  { %3446 = vpow2.f32 %v1581_v38 }
0x120e   :  { %v1780_v39 = vpop.xlane.xlu1 %1779 }
0x120f   :  { %v1784_v40 = vsub.f32 %v1776_v14, %v1780_v39 }
0x1211   :  { %v1786_v41 = vmul.f32 1.442695, %v1784_v40 }
0x1212   :  { %v1783_v35 = vpop.xlane.xlu1 %1782 }
0x1213   :  { %3448 = vpow2.f32 %v1786_v41  ;;  %v1785_v42 = vsub.f32 %v1777_v30, %v1783_v35 }
0x1214   :  { %v3445_v43 = vpop.eup %3444 }
0x1215   :  { %v1788_v32 = vmul.f32 1.442695, %v1785_v42  ;;  %v1588_v44 = vsel %vm229_vm4, %v3445_v43, 0.0  ;;  %v3447_v9 = vpop.eup %3446 }
0x1216   :  { %1589 = vadd.xlane.f32.xlu1 %v1588_v44  ;;  %v1585_v10 = vsel %vm229_vm4, %v3447_v9, 0.0  ;;  %v3955_v44 = vld [vmem:[%s4086_s2 + $0x8] sm:$0xff] }
0x1217   :  { %3450 = vpow2.f32 %v1788_v32 }
0x121a   :  { %1586 = vadd.xlane.f32.xlu1 %v1585_v10  ;;  %v3961_v10 = vld [vmem:[%s4086_s2] sm:$0xff]  ;;  %s4104_s2 = smov 72  }
0x121d   :  { %v3449_v45 = vpop.eup %3448 }
0x121e   :  { %v1790_v46 = vsel %vm229_vm4, %v3449_v45, 0.0 }
0x121f   :  { %1791 = vadd.xlane.f32.xlu0 %v1790_v46 }
0x1221   :  { %v3451_v47 = vpop.eup %3450 }
0x1222   :  { %v1793_v48 = vsel %vm229_vm4, %v3451_v47, 0.0 }
0x1223   :  { %1794 = vadd.xlane.f32.xlu1 %v1793_v48 }
0x1234   :  { %3364 = vrot.lane.b32.xlu1 %v3877_v0, %s3518_s27 }
0x1235   :  { %3359 = vrot.lane.b32.xlu0 %v3877_v0, %s3515_s22 }
0x1238   :  { %3369 = vrot.lane.b32.xlu1 %v3877_v0, %s3516_s23 }
0x1239   :  { %1984 = vrot.lane.b32.xlu0 %v3869_v62, %s3517_s26 }
0x123c   :  { %1982 = vrot.lane.b32.xlu1 %v3867_v60, %s3517_s26 }
0x12a3   :  { %v1590_v49 = vpop.xlane.xlu1 %1589 }
0x12a7   :  { %v1587_v50 = vpop.xlane.xlu1 %1586 }
0x12a8   :  { %3452 = vrcp.f32 %v1587_v50 }
0x12a9   :  { %3454 = vrcp.f32 %v1590_v49 }
0x12ac   :  { %v1792_v51 = vpop.xlane.xlu0 %1791 }
0x12ad   :  { %3456 = vrcp.f32 %v1792_v51 }
0x12b0   :  { %v3360_v52 = vpop.permute.xlu0 %3359  ;;  %v1795_v53 = vpop.xlane.xlu1 %1794 }
0x12b1   :  { %v3362_v55 = vunpack.i.h.bf16 %v3360_v52  ;;  %v3361_v57 = vunpack.i.l.bf16 %v3360_v52  ;;  %3458 = vrcp.f32 %v1795_v53 }
0x12b2   :  { %v3453_v59 = vpop.eup %3452 }
0x12b3   :  { %v3258_v58 = vpack.c.bf16 %v3362_v55, %v3361_v57  ;;  %v1593_v61 = vmul.f32 %v3453_v59, %v3447_v9  ;;  %v3455_v63 = vpop.eup %3454 }
0x12b4   :  { %v3365_v2 = vpop.permute.xlu1 %3364  ;;  %v1594_v6 = vmul.f32 %v3455_v63, %v3445_v43  ;;  %v1985_v30 = vpop.permute.xlu0 %1984 }
0x12b5   :  { %v3367_v3 = vunpack.i.h.bf16 %v3365_v2  ;;  %v3366_v4 = vunpack.i.l.bf16 %v3365_v2  ;;  %3259 = vmatprep.subr.bf16.mxu1 %v3258_v58  ;;  %3123 = vmatprep.mubr.msk.f32.mxu1 %vm229_vm4, %v1593_v61 }
0x12b6   :  { %3261 = vmatpush3.bf16.msra.mxu1 %v3258_v58 }
0x12b7   :  { %v3457_v5 = vpop.eup %3456  ;;  %v3268_v7 = vpack.c.bf16 %v3367_v3, %v3366_v4 }
0x12b8   :  { %v3370_v8 = vpop.permute.xlu1 %3369  ;;  %v1798_v11 = vmul.f32 %v3457_v5, %v3449_v45 }
0x12b9   :  { %3124 = vmatmul.mubr.msk.f32.vlgmr.msra.gmra.mrb[18].mxu1 %vm229_vm4, %v1594_v6  ;;  %3269 = vmatprep.subr.bf16.mxu1 %v3268_v7  ;;  %v3372_v13 = vunpack.i.h.bf16 %v3370_v8  ;;  %v3371_v15 = vunpack.i.l.bf16 %v3370_v8 }
0x12ba   :  { %3271 = vmatpush3.bf16.msra.mxu1 %v3268_v7  ;;  %3137 = vmatprep.mubr.msk.f32.mxu1 %vm229_vm4, %v1798_v11 }
0x12bb   :  { %v3459_v19 = vpop.eup %3458  ;;  %3140 = vmatprep.subr.bf16.mxu1 %v3510_v1  ;;  %v3272_v20 = vpack.c.bf16 %v3372_v13, %v3371_v15 }
0x12bc   :  { %v1799_v16 = vmul.f32 %v3459_v19, %v3451_v47  ;;  %v1983_v29 = vpop.permute.xlu1 %1982 }
0x12be   :  { %3138 = vmatmul.mubr.msk.f32.vlgmr.msra.gmra.mrb[28].mxu1 %vm229_vm4, %v1799_v16  ;;  %v2830_v16 = vld [vmem:[%s4089_s5 + $0x18] sm:$0xf] }
0x12bf   :  { %3141 = vmatpush3.bf16.msra.mxu1 %v1892_v18  ;;  %3142 = vmatprep.mubr.msk.bf16.mxu1 %vm3511_vm0, %v3510_v1  ;;  %v2191_v18 = vsel %vm548_vm5, %v2830_v16, 0 }
0x12c0   :  { %3274 = vmatprep.subr.msk.bf16.mxu1 %vm3659_vm3, %v3272_v20 }
0x138c   :  { %v3125_v23 = vpop.f32.mrb[18].mxu1 }
0x138d   :  { %v1673_v25 = vpop.f32.mrb[19].mxu1 }
0x138e   :  { %v1682_v26 = vpack.c.bf16 %v3125_v23, %v1673_v25 }
0x1390   :  { %3149 = vmatmul.mubr.msk.bf16.vlgmr.msra.gmra.mrb[28].mxu0 %vm141_vm2, %v1682_v26 }
0x1391   :  { %v3139_v27 = vpop.f32.mrb[28].mxu1 }
0x1392   :  { %v1878_v28 = vpop.f32.mrb[29].mxu1 }
0x1393   :  { %v1887_v14 = vpack.c.bf16 %v3139_v27, %v1878_v28 }
0x1395   :  { %3143 = vmatmul.mubr.msk.bf16.vlgmr.msra.gmra.mrb[32].mxu1 %vm141_vm2, %v1887_v14 }
0x1396   :  { %3277 = vmatpush3.bf16.xpose.msk.msra.mxu1 %vm3659_vm3, %v3272_v20  ;;  %3156 = vmatprep.mubr.msk.f32.mxu1 %vm141_vm2, %v1983_v29 }
0x1397   :  { %3166 = vmatprep.subr.bf16.mxu1 %v3510_v1 }
0x139d   :  { %3157 = vmatmul.mubr.msk.f32.vlgmr.msra.gmra.mrb[30].mxu1 %vm141_vm2, %v1985_v30 }
0x139e   :  { %3168 = vmatprep.mubr.msk.bf16.mxu1 %vm3511_vm0, %v3510_v1  ;;  %3167 = vmatpush3.bf16.msra.mxu1 %v2191_v18 }
0x1463   :  { %v1975_v31 = vpop.f32.mrb[28].mxu0 }
0x1464   :  { %v3150_v17 = vpop.f32.mrb[29].mxu0 }
0x1465   :  { %v1978_v33 = vpop.f32.mrb[30].mxu0 }
0x1466   :  { %v3151_v34 = vpop.f32.mrb[31].mxu0 }
0x1468   :  { %v1928_v36 = vpop.f32.mrb[32].mxu1 }
0x1469   :  { %v3948_v37 = vadd.f32 %v1975_v31, %v1928_v36  ;;  %v3144_v38 = vpop.f32.mrb[33].mxu1 }
0x146a   :  { %v1931_v39 = vpop.f32.mrb[34].mxu1 }
0x146b   :  { %v3950_v40 = vadd.f32 %v1978_v33, %v1931_v39  ;;  %v3145_v41 = vpop.f32.mrb[35].mxu1 }
0x1470   :  { %v3158_v35 = vpop.f32.mrb[30].mxu1 }
0x1471   :  { %v2074_v42 = vmul.f32 0.35355338, %v3158_v35  ;;  %v2064_v43 = vpop.f32.mrb[31].mxu1 }
0x1472   :  { %v2073_v32 = vmul.f32 0.35355338, %v2064_v43 }
0x1473   :  { %v2076_v9 = vadd.f32 %v3955_v44, %v2074_v42 }
0x1474   :  { %v2075_v45 = vadd.f32 %v3961_v10, %v2073_v32 }
0x1475   :  { %v2080_v46 = vsel %vm229_vm4, %v2076_v9, -inf }
0x1476   :  { %2081 = vmax.xlane.f32.xlu0 %v2080_v46  ;;  %v2077_v47 = vsel %vm229_vm4, %v2075_v45, -inf }
0x1477   :  { %2078 = vmax.xlane.f32.xlu1 %v2077_v47 }
0x1488   :  { %3374 = vrot.lane.b32.xlu1 %v3877_v0, %s3521_s18 }
0x148c   :  { %2236 = vrot.lane.b32.xlu1 %v3867_v60, %s3520_s30 }
0x1490   :  { %2238 = vrot.lane.b32.xlu1 %v3869_v62, %s3520_s30 }
0x1503   :  { %v2082_v48 = vpop.xlane.xlu0 %2081 }
0x1504   :  { %v2084_v49 = vsub.f32 %v2076_v9, %v2082_v48  ;;  %v2079_v50 = vpop.xlane.xlu1 %2078 }
0x1505   :  { %v2083_v51 = vsub.f32 %v2075_v45, %v2079_v50 }
0x1506   :  { %v2087_v52 = vmul.f32 1.442695, %v2084_v49 }
0x1507   :  { %v2085_v53 = vmul.f32 1.442695, %v2083_v51 }
0x1508   :  { %3460 = vpow2.f32 %v2087_v52  ;;  %v3375_v55 = vpop.permute.xlu1 %3374 }
0x1509   :  { %v3377_v57 = vunpack.i.h.bf16 %v3375_v55  ;;  %v3376_v59 = vunpack.i.l.bf16 %v3375_v55  ;;  %3462 = vpow2.f32 %v2085_v53 }
0x150b   :  { %v3278_v58 = vpack.c.bf16 %v3377_v57, %v3376_v59 }
0x150c   :  { %v2237_v15 = vpop.permute.xlu1 %2236 }
0x150d   :  { %3279 = vmatprep.subr.bf16.mxu0 %v3278_v58 }
0x150e   :  { %3281 = vmatpush3.bf16.msra.mxu0 %v3278_v58 }
0x1510   :  { %v2239_v19 = vpop.permute.xlu1 %2238 }
0x1512   :  { %v3461_v61 = vpop.eup %3460 }
0x1513   :  { %v2092_v60 = vsel %vm229_vm4, %v3461_v61, 0.0  ;;  %v3463_v63 = vpop.eup %3462 }
0x1514   :  { %2093 = vadd.xlane.f32.xlu0 %v2092_v60  ;;  %v2089_v62 = vsel %vm229_vm4, %v3463_v63, 0.0 }
0x1518   :  { %2090 = vadd.xlane.f32.xlu0 %v2089_v62 }
0x152e   :  { %3379 = vrot.lane.b32.xlu0 %v3877_v0, %s4104_s2 }
0x15a1   :  { %v2094_v2 = vpop.xlane.xlu0 %2093 }
0x15a2   :  { %3464 = vrcp.f32 %v2094_v2 }
0x15a5   :  { %v2091_v3 = vpop.xlane.xlu0 %2090 }
0x15a6   :  { %3466 = vrcp.f32 %v2091_v3 }
0x15a9   :  { %v3380_v4 = vpop.permute.xlu0 %3379 }
0x15aa   :  { %v3382_v5 = vunpack.i.h.bf16 %v3380_v4  ;;  %v3381_v6 = vunpack.i.l.bf16 %v3380_v4 }
0x15ac   :  { %v3282_v7 = vpack.c.bf16 %v3382_v5, %v3381_v6  ;;  %v3465_v8 = vpop.eup %3464 }
0x15ad   :  { %v2098_v13 = vmul.f32 %v3465_v8, %v3461_v61  ;;  %v2861_v61 = vld [vmem:[%s4090_s6 + $0x1] ss:$0 sm:$0xff] }
0x15ae   :  { %3284 = vmatprep.subr.msk.bf16.mxu0 %vm3659_vm3, %v3282_v7 }
0x15b0   :  { %v3467_v11 = vpop.eup %3466 }
0x15b1   :  { %v2097_v12 = vmul.f32 %v3467_v11, %v3463_v63 }
0x15b3   :  { %3163 = vmatprep.mubr.msk.f32.mxu0 %vm229_vm4, %v2097_v12 }
0x15b4   :  { %3164 = vmatmul.mubr.msk.f32.vlgmr.msra.gmra.mrb[26].mxu0 %vm229_vm4, %v2098_v13 }
0x15b5   :  { %3287 = vmatpush3.bf16.xpose.msk.msra.mxu0 %vm3659_vm3, %v3282_v7  ;;  %3176 = vmatprep.mubr.msk.f32.mxu0 %vm141_vm2, %v2237_v15 }
0x15b6   :  { %3186 = vmatprep.subr.bf16.mxu0 %v3510_v1 }
0x15bc   :  { %3177 = vmatmul.mubr.msk.f32.vlgmr.msra.gmra.mrb[32].mxu0 %vm141_vm2, %v2239_v19 }
0x15bd   :  { %3188 = vmatprep.mubr.msk.bf16.mxu0 %vm3511_vm0, %v3510_v1 }
0x1687   :  { %v3165_v20 = vpop.f32.mrb[26].mxu0 }
0x1688   :  { %v2177_v24 = vpop.f32.mrb[27].mxu0 }
0x1689   :  { %v2186_v21 = vpack.c.bf16 %v3165_v20, %v2177_v24 }
0x168b   :  { %3169 = vmatmul.mubr.msk.bf16.vlgmr.msra.gmra.mrb[36].mxu1 %vm141_vm2, %v2186_v21 }
0x168f   :  { %v3178_v22 = vpop.f32.mrb[32].mxu0 }
0x1690   :  { %v2328_v23 = vmul.f32 0.35355338, %v3178_v22  ;;  %v2318_v25 = vpop.f32.mrb[33].mxu0  ;;  %v3399_v22 = vld [vmem:[%s4093_s9 + $0x18] sm:$0xff]  }
0x1691   :  { %v2327_v26 = vmul.f32 0.35355338, %v2318_v25  ;;  %v3401_v25 = vld [vmem:[%s4095_s11 + $0x28] sm:$0xff]  }
0x1692   :  { %v2330_v27 = vadd.f32 %v3955_v44, %v2328_v23  ;;  %v3400_v23 = vld [vmem:[%s4095_s11 + $0x20] sm:$0xff]  }
0x1693   :  { %v2329_v28 = vadd.f32 %v3961_v10, %v2327_v26 }
0x1694   :  { %v2334_v14 = vsel %vm229_vm4, %v2330_v27, -inf }
0x1695   :  { %2335 = vmax.xlane.f32.xlu0 %v2334_v14  ;;  %v2331_v29 = vsel %vm229_vm4, %v2329_v28, -inf }
0x1696   :  { %2332 = vmax.xlane.f32.xlu1 %v2331_v29 }
0x16a7   :  { %3384 = vrot.lane.b32.xlu1 %v3877_v0, %s4105_s25 }
0x1722   :  { %v2336_v30 = vpop.xlane.xlu0 %2335 }
0x1723   :  { %v2338_v31 = vsub.f32 %v2330_v27, %v2336_v30  ;;  %v2333_v17 = vpop.xlane.xlu1 %2332 }
0x1724   :  { %v2337_v33 = vsub.f32 %v2329_v28, %v2333_v17 }
0x1725   :  { %v2341_v34 = vmul.f32 1.442695, %v2338_v31 }
0x1726   :  { %v2339_v36 = vmul.f32 1.442695, %v2337_v33  ;;  %v2864_v33 = vld [vmem:[%s4091_s7 + $0x1] ss:$0 sm:$0xff] }
0x1727   :  { %v3385_v38 = vpop.permute.xlu1 %3384 }
0x1728   :  { %3468 = vpow2.f32 %v2339_v36  ;;  %v3387_v39 = vunpack.i.h.bf16 %v3385_v38  ;;  %v3386_v41 = vunpack.i.l.bf16 %v3385_v38 }
0x1729   :  { %3470 = vpow2.f32 %v2341_v34 }
0x172a   :  { %v3288_v35 = vpack.c.bf16 %v3387_v39, %v3386_v41  ;;  %v2865_v39 = vld [vmem:[%s4092_s8 + $0x1] ss:$0 sm:$0xff] }
0x172c   :  { %3289 = vmatprep.subr.bf16.mxu1 %v3288_v35 }
0x172d   :  { %3291 = vmatpush3.bf16.msra.mxu1 %v3288_v35 }
0x172e   :  { %3192 = vmatprep.subr.bf16.mxu1 %v3510_v1 }
0x1732   :  { %v3469_v42 = vpop.eup %3468 }
0x1733   :  { %v2343_v43 = vsel %vm229_vm4, %v3469_v42, 0.0  ;;  %v3471_v0 = vpop.eup %3470 }
0x1734   :  { %2344 = vadd.xlane.f32.xlu0 %v2343_v43  ;;  %v2346_v32 = vsel %vm229_vm4, %v3471_v0, 0.0 }
0x1738   :  { %2347 = vadd.xlane.f32.xlu0 %v2346_v32  ;;  %v3403_v32 = vld [vmem:[%s4095_s11 + $0x38] sm:$0xff]  }
0x175e   :  { %v2227_v44 = vpop.f32.mrb[36].mxu1 }
0x175f   :  { %v2234_v9 = vadd.f32 %v2227_v44, %v3948_v37  ;;  %v3170_v10 = vpop.f32.mrb[37].mxu1  ;;  %v2831_v37 = vld [vmem:[%s4089_s5 + $0x1c] sm:$0xf]  ;;  %v2871_v44 = vld [vmem:[%s4094_s10 + $0x1] ss:$0 sm:$0xff] }
0x1760   :  { %v2230_v45 = vpop.f32.mrb[38].mxu1 }
0x1761   :  { %v2235_v46 = vadd.f32 %v2230_v45, %v3950_v40  ;;  %v3171_v47 = vpop.f32.mrb[39].mxu1  ;;  %v2445_v40 = vsel %vm548_vm5, %v2831_v37, 0 }
0x1762   :  { %3187 = vmatpush3.bf16.msra.mxu0 %v2445_v40 }
0x1763   :  { %3200 = vmatprep.subr.bf16.mxu0 %v3510_v1 }
0x17c1   :  { %v2345_v48 = vpop.xlane.xlu0 %2344 }
0x17c2   :  { %3472 = vrcp.f32 %v2345_v48 }
0x17c5   :  { %v2348_v49 = vpop.xlane.xlu0 %2347 }
0x17c6   :  { %3474 = vrcp.f32 %v2348_v49 }
0x17cc   :  { %v3473_v50 = vpop.eup %3472 }
0x17cd   :  { %v2351_v51 = vmul.f32 %v3473_v50, %v3469_v42 }
0x17cf   :  { %3183 = vmatprep.mubr.msk.f32.mxu1 %vm229_vm4, %v2351_v51 }
0x17d0   :  { %v3475_v52 = vpop.eup %3474 }
0x17d1   :  { %v2352_v53 = vmul.f32 %v3475_v52, %v3471_v0  ;;  %v3402_v0 = vld [vmem:[%s4095_s11 + $0x30] sm:$0xff]  }
0x17d3   :  { %3184 = vmatmul.mubr.msk.f32.vlgmr.msra.gmra.mrb[40].mxu1 %vm229_vm4, %v2352_v53 }
0x17d4   :  { %3196 = vmatprep.mubr.msk.bf16.mxu1 %vm3511_vm0, %v3510_v1 }
0x18a6   :  { %v3185_v55 = vpop.f32.mrb[40].mxu1 }
0x18a7   :  { %v2431_v57 = vpop.f32.mrb[41].mxu1 }
0x18a8   :  { %v2440_v59 = vpack.c.bf16 %v3185_v55, %v2431_v57 }
0x18aa   :  { %3189 = vmatmul.mubr.msk.bf16.vlgmr.msra.gmra.mrb[36].mxu0 %vm141_vm2, %v2440_v59 }
0x18ab   :  { %3208 = vmatprep.mubr.msk.bf16.mxu0 %vm3511_vm0, %v3510_v1  ;;  %3201 = vmatpush3.bf16.msra.mxu0 %v3400_v23 }
0x18ac   :  { %3202 = vmatprep.subr.bf16.mxu0 %v3510_v1 }
0x18af   :  { %3203 = vmatpush3.bf16.msra.mxu0 %v3401_v25 }
0x18b0   :  { %3204 = vmatprep.subr.bf16.mxu0 %v3510_v1 }
0x18b3   :  { %3205 = vmatpush3.bf16.msra.mxu0 %v3402_v0 }
0x18b4   :  { %3206 = vmatprep.subr.bf16.mxu0 %v3510_v1 }
0x18b7   :  { %3207 = vmatpush3.bf16.msra.mxu0 %v3403_v32 }
0x197d   :  { %v2481_v58 = vpop.f32.mrb[36].mxu0 }
0x197e   :  { %v2488_v60 = vadd.f32 %v2481_v58, %v2234_v9  ;;  %v3190_v63 = vpop.f32.mrb[37].mxu0 }
0x197f   :  { %v2484_v62 = vpop.f32.mrb[38].mxu0 }
0x1980   :  { %v2498_v2 = vadd.f32 %v2861_v61, %v2488_v60  ;;  %v2489_v3 = vadd.f32 %v2484_v62, %v2235_v46  ;;  %v3191_v4 = vpop.f32.mrb[39].mxu0 }
0x1982   :  { %v2499_v5 = vadd.f32 %v2861_v61, %v2489_v3  ;;  %v2500_v6 = vadd.f32 %v2498_v2, %v3857_v54 }
0x1984   :  { %v2506_v7 = vsel %vm86_vm1, %v2500_v6, 0.0  ;;  %v2501_v8 = vadd.f32 %v2499_v5, %v3859_v56  ;;  %v3398_v56 = vld [vmem:[%s4093_s9 + $0x10] sm:$0xff]  }
0x1985   :  { %2507 = vadd.xlane.f32.xlu0 %v2506_v7  ;;  %3193 = vmatpush3.bf16.msra.mxu1 %v3398_v56 }
0x1986   :  { %v2509_v11 = vsel %vm86_vm1, %v2501_v8, 0.0  ;;  %3194 = vmatprep.subr.bf16.mxu1 %v3510_v1  ;;  %v2884_v1 = vld [vmem:[%s4096_s12 + $0x1] ss:$0 sm:$0xff] }
0x1989   :  { %2510 = vadd.xlane.f32.xlu0 %v2509_v11  ;;  %3195 = vmatpush3.bf16.msra.mxu1 %v3399_v22 }
0x1a12   :  { %v2508_v12 = vpop.xlane.xlu0 %2507 }
0x1a13   :  { %v2512_v13 = vmul.f32 0.03125, %v2508_v12 }
0x1a15   :  { %v2514_v15 = vsub.f32 %v2500_v6, %v2512_v13 }
0x1a16   :  { %v2511_v19 = vpop.xlane.xlu0 %2510 }
0x1a17   :  { %v2513_v16 = vmul.f32 0.03125, %v2511_v19  ;;  %v2516_v18 = vmul.f32 %v2514_v15, %v2514_v15 }
0x1a19   :  { %v2515_v20 = vsub.f32 %v2501_v8, %v2513_v16  ;;  %v2518_v24 = vsel %vm86_vm1, %v2516_v18, 0.0 }
0x1a1a   :  { %2519 = vadd.xlane.f32.xlu0 %v2518_v24  ;;  %v2892_v24 = vld [vmem:[%s4097_s13 + $0x1] ss:$0 sm:$0xff] }
0x1a1b   :  { %v2517_v21 = vmul.f32 %v2515_v20, %v2515_v20 }
0x1a1d   :  { %v2521_v54 = vsel %vm86_vm1, %v2517_v21, 0.0 }
0x1a1e   :  { %2522 = vadd.xlane.f32.xlu0 %v2521_v54  ;;  %v2893_v54 = vld [vmem:[%s4098_s14 + $0x1] ss:$0 sm:$0xff] }
0x1aa7   :  { %v2520_v26 = vpop.xlane.xlu0 %2519 }
0x1aa8   :  { %v2524_v27 = vmul.f32 0.03125, %v2520_v26 }
0x1aaa   :  { %v2526_v28 = vadd.f32 1e-05, %v2524_v27 }
0x1aab   :  { %v2523_v14 = vpop.xlane.xlu0 %2522 }
0x1aac   :  { %3476 = vrsqrt.f32 %v2526_v28  ;;  %v2525_v29 = vmul.f32 0.03125, %v2523_v14 }
0x1aae   :  { %v2527_v30 = vadd.f32 1e-05, %v2525_v29 }
0x1ab0   :  { %3478 = vrsqrt.f32 %v2527_v30 }
0x1ab6   :  { %v3477_v31 = vpop.eup %3476 }
0x1ab7   :  { %v2530_v17 = vmul.f32 %v3477_v31, %v2514_v15 }
0x1ab9   :  { %v2538_v36 = vmul.f32 %v2864_v33, %v2530_v17 }
0x1aba   :  { %v3479_v34 = vpop.eup %3478 }
0x1abb   :  { %v2531_v38 = vmul.f32 %v3479_v34, %v2515_v20  ;;  %v2546_v35 = vadd.f32 %v2865_v39, %v2538_v36 }
0x1abd   :  { %v2539_v41 = vmul.f32 %v2864_v33, %v2531_v38 }
0x1abf   :  { %v2547_v42 = vadd.f32 %v2865_v39, %v2539_v41 }
0x1ac1   :  { %v2548_v43 = vpack.c.bf16 %v2547_v42, %v2546_v35 }
0x1ac3   :  { %3197 = vmatmul.mubr.msk.bf16.vlgmr.msra.gmra.mrb[44].mxu1 %vm86_vm1, %v2548_v43 }
0x1b96   :  { %v2611_v9 = vpop.f32.mrb[44].mxu1 }
0x1b97   :  { %v2612_v10 = vadd.f32 %v2871_v44, %v2611_v9  ;;  %v3198_v45 = vpop.f32.mrb[45].mxu1 }
0x1b98   :  { %v2614_v46 = vpop.f32.mrb[46].mxu1 }
0x1b99   :  { %v2615_v47 = vadd.f32 %v2871_v44, %v2614_v46  ;;  %v3199_v48 = vpop.f32.mrb[47].mxu1  ;;  %v2618_v49 = vmax.f32 %v2612_v10, 0.0 }
0x1b9b   :  { %v2619_v50 = vmax.f32 %v2615_v47, 0.0 }
0x1b9d   :  { %v2620_v51 = vpack.c.bf16 %v2619_v50, %v2618_v49 }
0x1b9f   :  { %3209 = vmatmul.mubr.msk.bf16.vlgmr.msra.gmra.mrb[40].mxu0 %vm1314_vm6, %v2620_v51 }
0x1c72   :  { %v2699_v52 = vpop.f32.mrb[40].mxu0 }
0x1c73   :  { %v2700_v53 = vadd.f32 %v2884_v1, %v2699_v52  ;;  %v3210_v37 = vpop.f32.mrb[41].mxu0 }
0x1c74   :  { %v2702_v40 = vpop.f32.mrb[42].mxu0 }
0x1c75   :  { %v2703_v55 = vadd.f32 %v2884_v1, %v2702_v40  ;;  %v3211_v57 = vpop.f32.mrb[43].mxu0  ;;  %v2706_v59 = vadd.f32 %v2700_v53, %v2546_v35 }
0x1c77   :  { %v2712_v58 = vsel %vm86_vm1, %v2706_v59, 0.0  ;;  %v2707_v61 = vadd.f32 %v2703_v55, %v2547_v42 }
0x1c78   :  { %2713 = vadd.xlane.f32.xlu1 %v2712_v58 }
0x1c79   :  { %v2715_v60 = vsel %vm86_vm1, %v2707_v61, 0.0 }
0x1c7a   :  { %2716 = vadd.xlane.f32.xlu0 %v2715_v60 }
0x1d05   :  { %v2714_v63 = vpop.xlane.xlu1 %2713 }
0x1d06   :  { %v2718_v62 = vmul.f32 0.03125, %v2714_v63 }
0x1d07   :  { %v2717_v2 = vpop.xlane.xlu0 %2716 }
0x1d08   :  { %v2720_v3 = vsub.f32 %v2706_v59, %v2718_v62  ;;  %v2719_v4 = vmul.f32 0.03125, %v2717_v2 }
0x1d0a   :  { %v2721_v5 = vsub.f32 %v2707_v61, %v2719_v4  ;;  %v2722_v6 = vmul.f32 %v2720_v3, %v2720_v3 }
0x1d0c   :  { %v2724_v7 = vsel %vm86_vm1, %v2722_v6, 0.0  ;;  %v2723_v8 = vmul.f32 %v2721_v5, %v2721_v5 }
0x1d0d   :  { %2725 = vadd.xlane.f32.xlu0 %v2724_v7 }
0x1d0e   :  { %v2727_v11 = vsel %vm86_vm1, %v2723_v8, 0.0 }
0x1d11   :  { %2728 = vadd.xlane.f32.xlu0 %v2727_v11 }
0x1d9a   :  { %v2726_v12 = vpop.xlane.xlu0 %2725 }
0x1d9b   :  { %v2730_v13 = vmul.f32 0.03125, %v2726_v12 }
0x1d9d   :  { %v2732_v15 = vadd.f32 1e-05, %v2730_v13 }
0x1d9e   :  { %v2729_v19 = vpop.xlane.xlu0 %2728 }
0x1d9f   :  { %3480 = vrsqrt.f32 %v2732_v15  ;;  %v2731_v16 = vmul.f32 0.03125, %v2729_v19 }
0x1da1   :  { %v2733_v18 = vadd.f32 1e-05, %v2731_v16 }
0x1da3   :  { %3482 = vrsqrt.f32 %v2733_v18 }
0x1da9   :  { %v3481_v20 = vpop.eup %3480 }
0x1daa   :  { %v2736_v21 = vmul.f32 %v3481_v20, %v2720_v3 }
0x1dac   :  { %v2744_v56 = vmul.f32 %v2892_v24, %v2736_v21 }
0x1dad   :  { %v3483_v22 = vpop.eup %3482 }
0x1dae   :  { %v2737_v23 = vmul.f32 %v3483_v22, %v2721_v5  ;;  %v2752_v25 = vadd.f32 %v2893_v54, %v2744_v56 }
0x1db0   :  { %v2745_v26 = vmul.f32 %v2892_v24, %v2737_v23  ;;  %2754 = vst.msk [vmem:[#allocation2] sm:$0xff] %vm86_vm1, %v2752_v25 }
0x1db2   :  { %v2753_v27 = vadd.f32 %v2893_v54, %v2745_v26 }
0x1db4   :  { %2755 = vst.msk [vmem:[#allocation2 + $0x8] sm:$0xff] %vm86_vm1, %v2753_v27 }
0x1db5   :  { %3497 = shalt.err (!%p3494_p4)
}
0x1db6   :  { %s3498_s20 = scalar_lea.hbm %s4099_s15, 256 }
0x1db7   :  { %p3499_p5 = scmp.ne.s32.totalorder %s4099_s15, %s3498_s20  ;;  %p3502_p6 = scmp.lt.u32.totalorder %s3498_s20, %s4099_s15 }
0x1db9   :  { %p3504_p7 = pnand %p3502_p6, %p3499_p5 }
0x1dbb   :  { %3507 = shalt.err (!%p3504_p7)
}
0x1dbc   :  { %s3524_s21 = smov 128   ;;  %s3525_s24 = smov 8  }
0x1dbd   :  { %2767 = dma.vmem_to_hbm [thread:$0]  %s2762_s29, 256, %s4099_s15, [#allocation3], %s3524_s21, %s3524_s21, %s3525_s24  }
0x1dbe   :  { %3508 = dma.done.wait [#allocation3], 256  }
0x1dbf   :  { %3509 = vsyncadd [#allocation3], 4294967040 }
0x1dc0   :  { %2771 = vsyncpa [#allocation3], 1 }

</bundles_post_ra>
